<compile_context>
chip_gen: v7x
topology: tpu7x:2x2x1
jax: 0.10.0
libtpu: 0.0.40
codegen_flags: <defaults>
</compile_context>

<pallas_src>
import math
import jax
import jax.numpy as jnp
from jax.experimental import pallas as pl
from jax.experimental.pallas import tpu as pltpu

# ------------------------- config (small, self-consistent) -------------------
B, S, H = 2, 8, 32          # batch, seq, hidden
NH, DH = 4, 8               # heads, head dim (NH*DH == H)
FFN = 64                    # feed-forward width
VOCAB = 100
NUM_LABELS = 4
NUM_LAYERS = 2
LN_EPS = 1e-12
assert NH * DH == H


def _layernorm(x, g, b, eps=LN_EPS):
    # Fused-statistics LayerNorm: var from E[x^2] - E[x]^2 (one pass over x).
    mu = jnp.mean(x, axis=-1, keepdims=True)
    msq = jnp.mean(x * x, axis=-1, keepdims=True)
    var = msq - mu * mu
    return (x - mu) * jax.lax.rsqrt(var + eps) * g + b


# ------------------------------ fused kernel ----------------------------------
def fused_forward_kernel(x_ref, mask_ref,
                         emb_g_ref, emb_b_ref,
                         wq_ref, bq_ref, wk_ref, bk_ref, wv_ref, bv_ref,
                         wo_ref, bo_ref,
                         ln1g_ref, ln1b_ref,
                         w1_ref, b1_ref, w2_ref, b2_ref,
                         ln2g_ref, ln2b_ref,
                         wp_ref, bp_ref, wc_ref,
                         o_ref):
    f32 = jnp.float32
    bf16 = jnp.bfloat16

    # One batch element per grid step: activation is (S, H), resident in VMEM.
    x = _layernorm(x_ref[0].astype(f32), emb_g_ref[...], emb_b_ref[...])   # (S,H)
    mask = mask_ref[...]                                                   # (1,1,S)

    for l in range(NUM_LAYERS):                       # static unroll over layers
        x_bf = x.astype(bf16)

        # full-width projections (1/sqrt(DH) folded into Q weights/bias)
        q = jnp.dot(x_bf, wq_ref[l], preferred_element_type=f32) + bq_ref[l]
        k = jnp.dot(x_bf, wk_ref[l], preferred_element_type=f32) + bk_ref[l]
        v = jnp.dot(x_bf, wv_ref[l], preferred_element_type=f32) + bv_ref[l]

        # split heads: (S,H) -> (NH,S,DH) (leading head axis, no lane slicing)
        qh = jnp.swapaxes(q.reshape(S, NH, DH), 0, 1).astype(bf16)
        kh = jnp.swapaxes(k.reshape(S, NH, DH), 0, 1).astype(bf16)
        vh = jnp.swapaxes(v.reshape(S, NH, DH), 0, 1).astype(bf16)

        # per-batch-element attention (block-diagonal structure exploited by grid)
        s = jnp.einsum('hqd,hkd->hqk', qh, kh,
                       preferred_element_type=f32) + mask               # (NH,S,S)
        s = s - jnp.max(s, axis=-1, keepdims=True)
        p = jnp.exp(s)
        p = p * pl.reciprocal(jnp.sum(p, axis=-1, keepdims=True), approx=True)

        ctx = jnp.einsum('hqk,hkd->hqd', p.astype(bf16), vh,
                         preferred_element_type=f32)                     # (NH,S,DH)
        ctx = jnp.swapaxes(ctx, 0, 1).reshape(S, H)                      # head concat

        # single (H,H) output projection (replaces per-head K=8 matmuls + reduce)
        attn_out = jnp.dot(ctx.astype(bf16), wo_ref[l],
                           preferred_element_type=f32) + bo_ref[l]
        x = _layernorm(x + attn_out, ln1g_ref[l], ln1b_ref[l])

        # FFN (bf16 matmul operands, f32 accumulate / elementwise)
        h1 = jnp.dot(x.astype(bf16), w1_ref[l],
                     preferred_element_type=f32) + b1_ref[l]
        # TODO(synk): HF BERT uses exact erf GELU; tanh approximation used here.
        h1 = jax.nn.gelu(h1, approximate=True)
        ffn = jnp.dot(h1.astype(bf16), w2_ref[l],
                      preferred_element_type=f32) + b2_ref[l]
        x = _layernorm(x + ffn, ln2g_ref[l], ln2b_ref[l])

    # pooler (tanh dense on CLS token) + bias-free classifier
    cls = x[0:1, :]                                                      # (1,H) static slice
    pooled = jnp.tanh(jnp.dot(cls.astype(bf16), wp_ref[...],
                              preferred_element_type=f32) + bp_ref[...])
    o_ref[0] = jnp.dot(pooled.astype(bf16), wc_ref[...],
                       preferred_element_type=f32)


# ------------------------------ parameters ------------------------------------
def init_params(key):
    def nrm(k, shape, std=0.02):
        return std * jax.random.normal(k, shape, dtype=jnp.float32)

    ks = iter(jax.random.split(key, 16))
    L = NUM_LAYERS
    return {
        "word_emb": nrm(next(ks), (VOCAB, H)),
        "pos_emb": nrm(next(ks), (S, H)),
        "emb_ln_g": jnp.ones((1, H), jnp.float32),
        "emb_ln_b": jnp.zeros((1, H), jnp.float32),
        "wq": nrm(next(ks), (L, H, H)), "bq": jnp.zeros((L, H), jnp.float32),
        "wk": nrm(next(ks), (L, H, H)), "bk": jnp.zeros((L, H), jnp.float32),
        "wv": nrm(next(ks), (L, H, H)), "bv": jnp.zeros((L, H), jnp.float32),
        "wo": nrm(next(ks), (L, H, H)), "bo": jnp.zeros((L, H), jnp.float32),
        "ln1_g": jnp.ones((L, 1, H), jnp.float32),
        "ln1_b": jnp.zeros((L, 1, H), jnp.float32),
        "w1": nrm(next(ks), (L, H, FFN)), "b1": jnp.zeros((L, 1, FFN), jnp.float32),
        "w2": nrm(next(ks), (L, FFN, H)), "b2": jnp.zeros((L, 1, H), jnp.float32),
        "ln2_g": jnp.ones((L, 1, H), jnp.float32),
        "ln2_b": jnp.zeros((L, 1, H), jnp.float32),
        "wp": nrm(next(ks), (H, H)),
        "bp": jnp.zeros((1, H), jnp.float32),
        "wc": nrm(next(ks), (H, NUM_LABELS)),   # classifier: bias=False
    }


def pack_params(p):
    """Fold attention scale into Q, reshape biases to 2-D rows, cast matmul
    weights to bf16 (biases / LN params stay f32). No per-head weight split."""
    L = NUM_LAYERS
    scale = 1.0 / math.sqrt(DH)
    bf16 = jnp.bfloat16
    return dict(
        emb_ln_g=p["emb_ln_g"], emb_ln_b=p["emb_ln_b"],
        wq=(p["wq"] * scale).astype(bf16), bq=(p["bq"] * scale).reshape(L, 1, H),
        wk=p["wk"].astype(bf16), bk=p["bk"].reshape(L, 1, H),
        wv=p["wv"].astype(bf16), bv=p["bv"].reshape(L, 1, H),
        wo=p["wo"].astype(bf16), bo=p["bo"].reshape(L, 1, H),
        ln1_g=p["ln1_g"], ln1_b=p["ln1_b"],
        w1=p["w1"].astype(bf16), b1=p["b1"],
        w2=p["w2"].astype(bf16), b2=p["b2"],
        ln2_g=p["ln2_g"], ln2_b=p["ln2_b"],
        wp=p["wp"].astype(bf16), bp=p["bp"],
        wc=p["wc"].astype(bf16),
    )


# ------------------------------ forward ---------------------------------------
@jax.jit
def forward(params, input_ids, attention_mask):
    pk = pack_params(params)

    # glue: embedding gather + position embeddings -> (B, S, H)
    x0 = (params["word_emb"][input_ids] + params["pos_emb"][None, :, :]
          ).astype(jnp.float32)

    # additive key-padding mask, (B, 1, S); broadcast over heads/queries in-kernel
    add_mask = ((1.0 - attention_mask.astype(jnp.float32)) * (-1e9)
                ).reshape(B, 1, S)

    operands = [x0, add_mask,
                pk["emb_ln_g"], pk["emb_ln_b"],
                pk["wq"], pk["bq"], pk["wk"], pk["bk"], pk["wv"], pk["bv"],
                pk["wo"], pk["bo"], pk["ln1_g"], pk["ln1_b"],
                pk["w1"], pk["b1"], pk["w2"], pk["b2"],
                pk["ln2_g"], pk["ln2_b"],
                pk["wp"], pk["bp"], pk["wc"]]

    def batch_spec(a):
        nd = a.ndim
        return pl.BlockSpec((1,) + a.shape[1:],
                            lambda b, _nd=nd: (b,) + (0,) * (_nd - 1))

    def full_spec(a):
        nd = a.ndim
        return pl.BlockSpec(a.shape, lambda b, _nd=nd: (0,) * _nd)

    in_specs = ([batch_spec(x0), batch_spec(add_mask)]
                + [full_spec(a) for a in operands[2:]])

    out = pl.pallas_call(
        fused_forward_kernel,
        grid=(B,),                                   # one batch element per step
        in_specs=in_specs,
        out_specs=pl.BlockSpec((1, 1, NUM_LABELS), lambda b: (b, 0, 0)),
        out_shape=jax.ShapeDtypeStruct((B, 1, NUM_LABELS), jnp.float32),
        compiler_params=pltpu.CompilerParams(
            dimension_semantics=("parallel",)),      # both TCs on v7x; serial on v5e/v6e
    )(*operands)
    return out.reshape(B, NUM_LABELS)


# TODO(synk): pretrained HF backbone weights are not reproducible in-script;
#             weights are deterministic synthetic initializations instead.

if __name__ == "__main__":
    key = jax.random.PRNGKey(0)
    k_param, k_ids = jax.random.split(key)
    params = init_params(k_param)

    input_ids = jax.random.randint(k_ids, (B, S), 0, VOCAB, dtype=jnp.int32)
    attention_mask = jnp.ones((B, S), dtype=jnp.int32)
    attention_mask = attention_mask.at[1, S - 2:].set(0)   # pad tail of batch 1

    logits = forward(params, input_ids, attention_mask)
    jax.block_until_ready(logits)
    assert logits.shape == (B, NUM_LABELS) and logits.dtype == jnp.float32
    assert bool(jnp.all(jnp.isfinite(logits)))
    print("KERNEL_OK")
</pallas_src>

<mosaic_0001>
module attributes {stable_mosaic.version = 11 : i64} {
  func.func @fused_forward_kernel(%arg0: i32, %arg1: memref<1x8x32xf32, #tpu.memory_space<vmem>>, %arg2: memref<1x1x8xf32, #tpu.memory_space<vmem>>, %arg3: memref<1x32xf32, #tpu.memory_space<vmem>>, %arg4: memref<1x32xf32, #tpu.memory_space<vmem>>, %arg5: memref<2x32x32xbf16, #tpu.memory_space<vmem>>, %arg6: memref<2x1x32xf32, #tpu.memory_space<vmem>>, %arg7: memref<2x32x32xbf16, #tpu.memory_space<vmem>>, %arg8: memref<2x1x32xf32, #tpu.memory_space<vmem>>, %arg9: memref<2x32x32xbf16, #tpu.memory_space<vmem>>, %arg10: memref<2x1x32xf32, #tpu.memory_space<vmem>>, %arg11: memref<2x32x32xbf16, #tpu.memory_space<vmem>>, %arg12: memref<2x1x32xf32, #tpu.memory_space<vmem>>, %arg13: memref<2x1x32xf32, #tpu.memory_space<vmem>>, %arg14: memref<2x1x32xf32, #tpu.memory_space<vmem>>, %arg15: memref<2x32x64xbf16, #tpu.memory_space<vmem>>, %arg16: memref<2x1x64xf32, #tpu.memory_space<vmem>>, %arg17: memref<2x64x32xbf16, #tpu.memory_space<vmem>>, %arg18: memref<2x1x32xf32, #tpu.memory_space<vmem>>, %arg19: memref<2x1x32xf32, #tpu.memory_space<vmem>>, %arg20: memref<2x1x32xf32, #tpu.memory_space<vmem>>, %arg21: memref<32x32xbf16, #tpu.memory_space<vmem>>, %arg22: memref<1x32xf32, #tpu.memory_space<vmem>>, %arg23: memref<32x4xbf16, #tpu.memory_space<vmem>>, %arg24: memref<1x1x4xf32, #tpu.memory_space<vmem>>) attributes {dimension_semantics = [#tpu.dimension_semantics<parallel>], iteration_bounds = array<i64: 2>, scalar_prefetch = 0 : i64, scratch_operands = 0 : i64, tpu.core_type = #tpu.core_type<tc>, window_params = [{transform_indices = @transform_0, window_bounds = array<i64: 1, 8, 32>}, {transform_indices = @transform_1, window_bounds = array<i64: 1, 1, 8>}, {pipeline_mode = #tpu.pipeline_mode<synchronous>, transform_indices = @transform_2, window_bounds = array<i64: 1, 32>}, {pipeline_mode = #tpu.pipeline_mode<synchronous>, transform_indices = @transform_3, window_bounds = array<i64: 1, 32>}, {pipeline_mode = #tpu.pipeline_mode<synchronous>, transform_indices = @transform_4, window_bounds = array<i64: 2, 32, 32>}, {pipeline_mode = #tpu.pipeline_mode<synchronous>, transform_indices = @transform_5, window_bounds = array<i64: 2, 1, 32>}, {pipeline_mode = #tpu.pipeline_mode<synchronous>, transform_indices = @transform_6, window_bounds = array<i64: 2, 32, 32>}, {pipeline_mode = #tpu.pipeline_mode<synchronous>, transform_indices = @transform_7, window_bounds = array<i64: 2, 1, 32>}, {pipeline_mode = #tpu.pipeline_mode<synchronous>, transform_indices = @transform_8, window_bounds = array<i64: 2, 32, 32>}, {pipeline_mode = #tpu.pipeline_mode<synchronous>, transform_indices = @transform_9, window_bounds = array<i64: 2, 1, 32>}, {pipeline_mode = #tpu.pipeline_mode<synchronous>, transform_indices = @transform_10, window_bounds = array<i64: 2, 32, 32>}, {pipeline_mode = #tpu.pipeline_mode<synchronous>, transform_indices = @transform_11, window_bounds = array<i64: 2, 1, 32>}, {pipeline_mode = #tpu.pipeline_mode<synchronous>, transform_indices = @transform_12, window_bounds = array<i64: 2, 1, 32>}, {pipeline_mode = #tpu.pipeline_mode<synchronous>, transform_indices = @transform_13, window_bounds = array<i64: 2, 1, 32>}, {pipeline_mode = #tpu.pipeline_mode<synchronous>, transform_indices = @transform_14, window_bounds = array<i64: 2, 32, 64>}, {pipeline_mode = #tpu.pipeline_mode<synchronous>, transform_indices = @transform_15, window_bounds = array<i64: 2, 1, 64>}, {pipeline_mode = #tpu.pipeline_mode<synchronous>, transform_indices = @transform_16, window_bounds = array<i64: 2, 64, 32>}, {pipeline_mode = #tpu.pipeline_mode<synchronous>, transform_indices = @transform_17, window_bounds = array<i64: 2, 1, 32>}, {pipeline_mode = #tpu.pipeline_mode<synchronous>, transform_indices = @transform_18, window_bounds = array<i64: 2, 1, 32>}, {pipeline_mode = #tpu.pipeline_mode<synchronous>, transform_indices = @transform_19, window_bounds = array<i64: 2, 1, 32>}, {pipeline_mode = #tpu.pipeline_mode<synchronous>, transform_indices = @transform_20, window_bounds = array<i64: 32, 32>}, {pipeline_mode = #tpu.pipeline_mode<synchronous>, transform_indices = @transform_21, window_bounds = array<i64: 1, 32>}, {pipeline_mode = #tpu.pipeline_mode<synchronous>, transform_indices = @transform_22, window_bounds = array<i64: 32, 4>}, {transform_indices = @transform_23, window_bounds = array<i64: 1, 1, 4>}]} {
    %c0 = arith.constant 0 : index
    %c0_0 = arith.constant 0 : index
    %c0_1 = arith.constant 0 : index
    %0 = vector.load %arg1[%c0, %c0_0, %c0_1] : memref<1x8x32xf32, #tpu.memory_space<vmem>>, vector<1x8x32xf32>
    %1 = vector.shape_cast %0 : vector<1x8x32xf32> to vector<8x32xf32>
    %c0_2 = arith.constant 0 : index
    %c0_3 = arith.constant 0 : index
    %2 = vector.load %arg3[%c0_2, %c0_3] : memref<1x32xf32, #tpu.memory_space<vmem>>, vector<1x32xf32>
    %c0_4 = arith.constant 0 : index
    %c0_5 = arith.constant 0 : index
    %3 = vector.load %arg4[%c0_4, %c0_5] : memref<1x32xf32, #tpu.memory_space<vmem>>, vector<1x32xf32>
    %cst = arith.constant dense<0.000000e+00> : vector<8xf32>
    %4 = vector.multi_reduction <add>, %1, %cst [1] : vector<8x32xf32> to vector<8xf32>
    %5 = vector.shape_cast %4 : vector<8xf32> to vector<8x1xf32>
    %cst_6 = arith.constant 3.200000e+01 : f32
    %6 = vector.broadcast %cst_6 : f32 to vector<8x1xf32>
    %7 = arith.divf %5, %6 : vector<8x1xf32>
    %8 = arith.mulf %1, %1 : vector<8x32xf32>
    %cst_7 = arith.constant dense<0.000000e+00> : vector<8xf32>
    %9 = vector.multi_reduction <add>, %8, %cst_7 [1] : vector<8x32xf32> to vector<8xf32>
    %10 = vector.shape_cast %9 : vector<8xf32> to vector<8x1xf32>
    %cst_8 = arith.constant 3.200000e+01 : f32
    %11 = vector.broadcast %cst_8 : f32 to vector<8x1xf32>
    %12 = arith.divf %10, %11 : vector<8x1xf32>
    %13 = arith.mulf %7, %7 : vector<8x1xf32>
    %14 = arith.subf %12, %13 : vector<8x1xf32>
    %15 = vector.broadcast %7 : vector<8x1xf32> to vector<8x32xf32>
    %16 = arith.subf %1, %15 : vector<8x32xf32>
    %cst_9 = arith.constant 9.99999996E-13 : f32
    %17 = vector.broadcast %cst_9 : f32 to vector<8x1xf32>
    %18 = arith.addf %14, %17 : vector<8x1xf32>
    %19 = math.rsqrt %18 : vector<8x1xf32>
    %20 = vector.broadcast %19 : vector<8x1xf32> to vector<8x32xf32>
    %21 = arith.mulf %16, %20 : vector<8x32xf32>
    %22 = vector.broadcast %2 : vector<1x32xf32> to vector<8x32xf32>
    %23 = arith.mulf %21, %22 : vector<8x32xf32>
    %24 = vector.broadcast %3 : vector<1x32xf32> to vector<8x32xf32>
    %25 = arith.addf %23, %24 : vector<8x32xf32>
    %c0_10 = arith.constant 0 : index
    %c0_11 = arith.constant 0 : index
    %c0_12 = arith.constant 0 : index
    %26 = vector.load %arg2[%c0_10, %c0_11, %c0_12] : memref<1x1x8xf32, #tpu.memory_space<vmem>>, vector<1x1x8xf32>
    %27 = arith.truncf %25 : vector<8x32xf32> to vector<8x32xbf16>
    %c0_13 = arith.constant 0 : index
    %c0_14 = arith.constant 0 : index
    %c0_15 = arith.constant 0 : index
    %28 = vector.load %arg5[%c0_13, %c0_14, %c0_15] : memref<2x32x32xbf16, #tpu.memory_space<vmem>>, vector<1x32x32xbf16>
    %29 = vector.shape_cast %28 : vector<1x32x32xbf16> to vector<32x32xbf16>
    %cst_16 = arith.constant dense<0.000000e+00> : vector<8x32xf32>
    %30 = tpu.matmul %27, %29, %cst_16 {dimension_numbers = #tpu.dot_dimension_numbers<[1], [0], [0], [1], [0, 0, 1, 1], [], []>} : vector<8x32xbf16>, vector<32x32xbf16>, vector<8x32xf32> -> vector<8x32xf32>
    %c0_17 = arith.constant 0 : index
    %c0_18 = arith.constant 0 : index
    %c0_19 = arith.constant 0 : index
    %31 = vector.load %arg6[%c0_17, %c0_18, %c0_19] : memref<2x1x32xf32, #tpu.memory_space<vmem>>, vector<1x1x32xf32>
    %32 = vector.shape_cast %31 : vector<1x1x32xf32> to vector<1x32xf32>
    %33 = vector.broadcast %32 : vector<1x32xf32> to vector<8x32xf32>
    %34 = arith.addf %30, %33 : vector<8x32xf32>
    %c0_20 = arith.constant 0 : index
    %c0_21 = arith.constant 0 : index
    %c0_22 = arith.constant 0 : index
    %35 = vector.load %arg7[%c0_20, %c0_21, %c0_22] : memref<2x32x32xbf16, #tpu.memory_space<vmem>>, vector<1x32x32xbf16>
    %36 = vector.shape_cast %35 : vector<1x32x32xbf16> to vector<32x32xbf16>
    %cst_23 = arith.constant dense<0.000000e+00> : vector<8x32xf32>
    %37 = tpu.matmul %27, %36, %cst_23 {dimension_numbers = #tpu.dot_dimension_numbers<[1], [0], [0], [1], [0, 0, 1, 1], [], []>} : vector<8x32xbf16>, vector<32x32xbf16>, vector<8x32xf32> -> vector<8x32xf32>
    %c0_24 = arith.constant 0 : index
    %c0_25 = arith.constant 0 : index
    %c0_26 = arith.constant 0 : index
    %38 = vector.load %arg8[%c0_24, %c0_25, %c0_26] : memref<2x1x32xf32, #tpu.memory_space<vmem>>, vector<1x1x32xf32>
    %39 = vector.shape_cast %38 : vector<1x1x32xf32> to vector<1x32xf32>
    %40 = vector.broadcast %39 : vector<1x32xf32> to vector<8x32xf32>
    %41 = arith.addf %37, %40 : vector<8x32xf32>
    %c0_27 = arith.constant 0 : index
    %c0_28 = arith.constant 0 : index
    %c0_29 = arith.constant 0 : index
    %42 = vector.load %arg9[%c0_27, %c0_28, %c0_29] : memref<2x32x32xbf16, #tpu.memory_space<vmem>>, vector<1x32x32xbf16>
    %43 = vector.shape_cast %42 : vector<1x32x32xbf16> to vector<32x32xbf16>
    %cst_30 = arith.constant dense<0.000000e+00> : vector<8x32xf32>
    %44 = tpu.matmul %27, %43, %cst_30 {dimension_numbers = #tpu.dot_dimension_numbers<[1], [0], [0], [1], [0, 0, 1, 1], [], []>} : vector<8x32xbf16>, vector<32x32xbf16>, vector<8x32xf32> -> vector<8x32xf32>
    %c0_31 = arith.constant 0 : index
    %c0_32 = arith.constant 0 : index
    %c0_33 = arith.constant 0 : index
    %45 = vector.load %arg10[%c0_31, %c0_32, %c0_33] : memref<2x1x32xf32, #tpu.memory_space<vmem>>, vector<1x1x32xf32>
    %46 = vector.shape_cast %45 : vector<1x1x32xf32> to vector<1x32xf32>
    %47 = vector.broadcast %46 : vector<1x32xf32> to vector<8x32xf32>
    %48 = arith.addf %44, %47 : vector<8x32xf32>
    %49 = vector.shape_cast %34 : vector<8x32xf32> to vector<8x4x8xf32>
    %50 = tpu.transpose %49, [1, 0, 2] : vector<8x4x8xf32> -> vector<4x8x8xf32>
    %51 = arith.truncf %50 : vector<4x8x8xf32> to vector<4x8x8xbf16>
    %52 = vector.shape_cast %41 : vector<8x32xf32> to vector<8x4x8xf32>
    %53 = tpu.transpose %52, [1, 0, 2] : vector<8x4x8xf32> -> vector<4x8x8xf32>
    %54 = arith.truncf %53 : vector<4x8x8xf32> to vector<4x8x8xbf16>
    %55 = vector.shape_cast %48 : vector<8x32xf32> to vector<8x4x8xf32>
    %56 = tpu.transpose %55, [1, 0, 2] : vector<8x4x8xf32> -> vector<4x8x8xf32>
    %57 = arith.truncf %56 : vector<4x8x8xf32> to vector<4x8x8xbf16>
    "tpu.trace_start"() <{level = 10 : i32, message = "hqd,hkd->hqk"}> : () -> ()
    %cst_34 = arith.constant dense<0.000000e+00> : vector<4x8x8xf32>
    %58 = tpu.matmul %51, %54, %cst_34 {dimension_numbers = #tpu.dot_dimension_numbers<[2], [2], [1], [1], [0, 0, 0, 1, 1, 1], [0], [0]>} : vector<4x8x8xbf16>, vector<4x8x8xbf16>, vector<4x8x8xf32> -> vector<4x8x8xf32>
    "tpu.trace_stop"() : () -> ()
    %59 = vector.broadcast %26 : vector<1x1x8xf32> to vector<4x8x8xf32>
    %60 = arith.addf %58, %59 : vector<4x8x8xf32>
    %cst_35 = arith.constant dense<0xFF800000> : vector<4x8xf32>
    %61 = vector.multi_reduction <maximumf>, %60, %cst_35 [2] : vector<4x8x8xf32> to vector<4x8xf32>
    %62 = vector.shape_cast %61 : vector<4x8xf32> to vector<4x8x1xf32>
    %63 = vector.broadcast %62 : vector<4x8x1xf32> to vector<4x8x8xf32>
    %64 = arith.subf %60, %63 : vector<4x8x8xf32>
    %65 = math.exp %64 : vector<4x8x8xf32>
    %cst_36 = arith.constant dense<0.000000e+00> : vector<4x8xf32>
    %66 = vector.multi_reduction <add>, %65, %cst_36 [2] : vector<4x8x8xf32> to vector<4x8xf32>
    %67 = vector.shape_cast %66 : vector<4x8xf32> to vector<4x8x1xf32>
    %68 = tpu.reciprocal %67 {approx = true} : vector<4x8x1xf32> -> vector<4x8x1xf32>
    %69 = vector.broadcast %68 : vector<4x8x1xf32> to vector<4x8x8xf32>
    %70 = arith.mulf %65, %69 : vector<4x8x8xf32>
    %71 = arith.truncf %70 : vector<4x8x8xf32> to vector<4x8x8xbf16>
    "tpu.trace_start"() <{level = 10 : i32, message = "hqk,hkd->hqd"}> : () -> ()
    %cst_37 = arith.constant dense<0.000000e+00> : vector<4x8x8xf32>
    %72 = tpu.matmul %71, %57, %cst_37 {dimension_numbers = #tpu.dot_dimension_numbers<[2], [1], [1], [2], [0, 0, 0, 1, 1, 2], [0], [0]>} : vector<4x8x8xbf16>, vector<4x8x8xbf16>, vector<4x8x8xf32> -> vector<4x8x8xf32>
    "tpu.trace_stop"() : () -> ()
    %73 = tpu.transpose %72, [1, 0, 2] : vector<4x8x8xf32> -> vector<8x4x8xf32>
    %74 = vector.shape_cast %73 : vector<8x4x8xf32> to vector<8x32xf32>
    %75 = arith.truncf %74 : vector<8x32xf32> to vector<8x32xbf16>
    %c0_38 = arith.constant 0 : index
    %c0_39 = arith.constant 0 : index
    %c0_40 = arith.constant 0 : index
    %76 = vector.load %arg11[%c0_38, %c0_39, %c0_40] : memref<2x32x32xbf16, #tpu.memory_space<vmem>>, vector<1x32x32xbf16>
    %77 = vector.shape_cast %76 : vector<1x32x32xbf16> to vector<32x32xbf16>
    %cst_41 = arith.constant dense<0.000000e+00> : vector<8x32xf32>
    %78 = tpu.matmul %75, %77, %cst_41 {dimension_numbers = #tpu.dot_dimension_numbers<[1], [0], [0], [1], [0, 0, 1, 1], [], []>} : vector<8x32xbf16>, vector<32x32xbf16>, vector<8x32xf32> -> vector<8x32xf32>
    %c0_42 = arith.constant 0 : index
    %c0_43 = arith.constant 0 : index
    %c0_44 = arith.constant 0 : index
    %79 = vector.load %arg12[%c0_42, %c0_43, %c0_44] : memref<2x1x32xf32, #tpu.memory_space<vmem>>, vector<1x1x32xf32>
    %80 = vector.shape_cast %79 : vector<1x1x32xf32> to vector<1x32xf32>
    %81 = vector.broadcast %80 : vector<1x32xf32> to vector<8x32xf32>
    %82 = arith.addf %78, %81 : vector<8x32xf32>
    %83 = arith.addf %25, %82 : vector<8x32xf32>
    %c0_45 = arith.constant 0 : index
    %c0_46 = arith.constant 0 : index
    %c0_47 = arith.constant 0 : index
    %84 = vector.load %arg13[%c0_45, %c0_46, %c0_47] : memref<2x1x32xf32, #tpu.memory_space<vmem>>, vector<1x1x32xf32>
    %85 = vector.shape_cast %84 : vector<1x1x32xf32> to vector<1x32xf32>
    %c0_48 = arith.constant 0 : index
    %c0_49 = arith.constant 0 : index
    %c0_50 = arith.constant 0 : index
    %86 = vector.load %arg14[%c0_48, %c0_49, %c0_50] : memref<2x1x32xf32, #tpu.memory_space<vmem>>, vector<1x1x32xf32>
    %87 = vector.shape_cast %86 : vector<1x1x32xf32> to vector<1x32xf32>
    %cst_51 = arith.constant dense<0.000000e+00> : vector<8xf32>
    %88 = vector.multi_reduction <add>, %83, %cst_51 [1] : vector<8x32xf32> to vector<8xf32>
    %89 = vector.shape_cast %88 : vector<8xf32> to vector<8x1xf32>
    %cst_52 = arith.constant 3.200000e+01 : f32
    %90 = vector.broadcast %cst_52 : f32 to vector<8x1xf32>
    %91 = arith.divf %89, %90 : vector<8x1xf32>
    %92 = arith.mulf %83, %83 : vector<8x32xf32>
    %cst_53 = arith.constant dense<0.000000e+00> : vector<8xf32>
    %93 = vector.multi_reduction <add>, %92, %cst_53 [1] : vector<8x32xf32> to vector<8xf32>
    %94 = vector.shape_cast %93 : vector<8xf32> to vector<8x1xf32>
    %cst_54 = arith.constant 3.200000e+01 : f32
    %95 = vector.broadcast %cst_54 : f32 to vector<8x1xf32>
    %96 = arith.divf %94, %95 : vector<8x1xf32>
    %97 = arith.mulf %91, %91 : vector<8x1xf32>
    %98 = arith.subf %96, %97 : vector<8x1xf32>
    %99 = vector.broadcast %91 : vector<8x1xf32> to vector<8x32xf32>
    %100 = arith.subf %83, %99 : vector<8x32xf32>
    %cst_55 = arith.constant 9.99999996E-13 : f32
    %101 = vector.broadcast %cst_55 : f32 to vector<8x1xf32>
    %102 = arith.addf %98, %101 : vector<8x1xf32>
    %103 = math.rsqrt %102 : vector<8x1xf32>
    %104 = vector.broadcast %103 : vector<8x1xf32> to vector<8x32xf32>
    %105 = arith.mulf %100, %104 : vector<8x32xf32>
    %106 = vector.broadcast %85 : vector<1x32xf32> to vector<8x32xf32>
    %107 = arith.mulf %105, %106 : vector<8x32xf32>
    %108 = vector.broadcast %87 : vector<1x32xf32> to vector<8x32xf32>
    %109 = arith.addf %107, %108 : vector<8x32xf32>
    %110 = arith.truncf %109 : vector<8x32xf32> to vector<8x32xbf16>
    %c0_56 = arith.constant 0 : index
    %c0_57 = arith.constant 0 : index
    %c0_58 = arith.constant 0 : index
    %111 = vector.load %arg15[%c0_56, %c0_57, %c0_58] : memref<2x32x64xbf16, #tpu.memory_space<vmem>>, vector<1x32x64xbf16>
    %112 = vector.shape_cast %111 : vector<1x32x64xbf16> to vector<32x64xbf16>
    %cst_59 = arith.constant dense<0.000000e+00> : vector<8x64xf32>
    %113 = tpu.matmul %110, %112, %cst_59 {dimension_numbers = #tpu.dot_dimension_numbers<[1], [0], [0], [1], [0, 0, 1, 1], [], []>} : vector<8x32xbf16>, vector<32x64xbf16>, vector<8x64xf32> -> vector<8x64xf32>
    %c0_60 = arith.constant 0 : index
    %c0_61 = arith.constant 0 : index
    %c0_62 = arith.constant 0 : index
    %114 = vector.load %arg16[%c0_60, %c0_61, %c0_62] : memref<2x1x64xf32, #tpu.memory_space<vmem>>, vector<1x1x64xf32>
    %115 = vector.shape_cast %114 : vector<1x1x64xf32> to vector<1x64xf32>
    %116 = vector.broadcast %115 : vector<1x64xf32> to vector<8x64xf32>
    %117 = arith.addf %113, %116 : vector<8x64xf32>
    %118 = arith.mulf %117, %117 : vector<8x64xf32>
    %119 = arith.mulf %117, %118 : vector<8x64xf32>
    %cst_63 = arith.constant 4.471500e-02 : f32
    %120 = vector.broadcast %cst_63 : f32 to vector<8x64xf32>
    %121 = arith.mulf %120, %119 : vector<8x64xf32>
    %122 = arith.addf %117, %121 : vector<8x64xf32>
    %cst_64 = arith.constant 0.797884583 : f32
    %123 = vector.broadcast %cst_64 : f32 to vector<8x64xf32>
    %124 = arith.mulf %123, %122 : vector<8x64xf32>
    %125 = math.tanh %124 : vector<8x64xf32>
    %cst_65 = arith.constant 1.000000e+00 : f32
    %126 = vector.broadcast %cst_65 : f32 to vector<8x64xf32>
    %127 = arith.addf %126, %125 : vector<8x64xf32>
    %cst_66 = arith.constant 5.000000e-01 : f32
    %128 = vector.broadcast %cst_66 : f32 to vector<8x64xf32>
    %129 = arith.mulf %128, %127 : vector<8x64xf32>
    %130 = arith.mulf %117, %129 : vector<8x64xf32>
    %131 = arith.truncf %130 : vector<8x64xf32> to vector<8x64xbf16>
    %c0_67 = arith.constant 0 : index
    %c0_68 = arith.constant 0 : index
    %c0_69 = arith.constant 0 : index
    %132 = vector.load %arg17[%c0_67, %c0_68, %c0_69] : memref<2x64x32xbf16, #tpu.memory_space<vmem>>, vector<1x64x32xbf16>
    %133 = vector.shape_cast %132 : vector<1x64x32xbf16> to vector<64x32xbf16>
    %cst_70 = arith.constant dense<0.000000e+00> : vector<8x32xf32>
    %134 = tpu.matmul %131, %133, %cst_70 {dimension_numbers = #tpu.dot_dimension_numbers<[1], [0], [0], [1], [0, 0, 1, 1], [], []>} : vector<8x64xbf16>, vector<64x32xbf16>, vector<8x32xf32> -> vector<8x32xf32>
    %c0_71 = arith.constant 0 : index
    %c0_72 = arith.constant 0 : index
    %c0_73 = arith.constant 0 : index
    %135 = vector.load %arg18[%c0_71, %c0_72, %c0_73] : memref<2x1x32xf32, #tpu.memory_space<vmem>>, vector<1x1x32xf32>
    %136 = vector.shape_cast %135 : vector<1x1x32xf32> to vector<1x32xf32>
    %137 = vector.broadcast %136 : vector<1x32xf32> to vector<8x32xf32>
    %138 = arith.addf %134, %137 : vector<8x32xf32>
    %139 = arith.addf %109, %138 : vector<8x32xf32>
    %c0_74 = arith.constant 0 : index
    %c0_75 = arith.constant 0 : index
    %c0_76 = arith.constant 0 : index
    %140 = vector.load %arg19[%c0_74, %c0_75, %c0_76] : memref<2x1x32xf32, #tpu.memory_space<vmem>>, vector<1x1x32xf32>
    %141 = vector.shape_cast %140 : vector<1x1x32xf32> to vector<1x32xf32>
    %c0_77 = arith.constant 0 : index
    %c0_78 = arith.constant 0 : index
    %c0_79 = arith.constant 0 : index
    %142 = vector.load %arg20[%c0_77, %c0_78, %c0_79] : memref<2x1x32xf32, #tpu.memory_space<vmem>>, vector<1x1x32xf32>
    %143 = vector.shape_cast %142 : vector<1x1x32xf32> to vector<1x32xf32>
    %cst_80 = arith.constant dense<0.000000e+00> : vector<8xf32>
    %144 = vector.multi_reduction <add>, %139, %cst_80 [1] : vector<8x32xf32> to vector<8xf32>
    %145 = vector.shape_cast %144 : vector<8xf32> to vector<8x1xf32>
    %cst_81 = arith.constant 3.200000e+01 : f32
    %146 = vector.broadcast %cst_81 : f32 to vector<8x1xf32>
    %147 = arith.divf %145, %146 : vector<8x1xf32>
    %148 = arith.mulf %139, %139 : vector<8x32xf32>
    %cst_82 = arith.constant dense<0.000000e+00> : vector<8xf32>
    %149 = vector.multi_reduction <add>, %148, %cst_82 [1] : vector<8x32xf32> to vector<8xf32>
    %150 = vector.shape_cast %149 : vector<8xf32> to vector<8x1xf32>
    %cst_83 = arith.constant 3.200000e+01 : f32
    %151 = vector.broadcast %cst_83 : f32 to vector<8x1xf32>
    %152 = arith.divf %150, %151 : vector<8x1xf32>
    %153 = arith.mulf %147, %147 : vector<8x1xf32>
    %154 = arith.subf %152, %153 : vector<8x1xf32>
    %155 = vector.broadcast %147 : vector<8x1xf32> to vector<8x32xf32>
    %156 = arith.subf %139, %155 : vector<8x32xf32>
    %cst_84 = arith.constant 9.99999996E-13 : f32
    %157 = vector.broadcast %cst_84 : f32 to vector<8x1xf32>
    %158 = arith.addf %154, %157 : vector<8x1xf32>
    %159 = math.rsqrt %158 : vector<8x1xf32>
    %160 = vector.broadcast %159 : vector<8x1xf32> to vector<8x32xf32>
    %161 = arith.mulf %156, %160 : vector<8x32xf32>
    %162 = vector.broadcast %141 : vector<1x32xf32> to vector<8x32xf32>
    %163 = arith.mulf %161, %162 : vector<8x32xf32>
    %164 = vector.broadcast %143 : vector<1x32xf32> to vector<8x32xf32>
    %165 = arith.addf %163, %164 : vector<8x32xf32>
    %166 = arith.truncf %165 : vector<8x32xf32> to vector<8x32xbf16>
    %c1 = arith.constant 1 : index
    %c0_85 = arith.constant 0 : index
    %c0_86 = arith.constant 0 : index
    %167 = vector.load %arg5[%c1, %c0_85, %c0_86] : memref<2x32x32xbf16, #tpu.memory_space<vmem>>, vector<1x32x32xbf16>
    %168 = vector.shape_cast %167 : vector<1x32x32xbf16> to vector<32x32xbf16>
    %cst_87 = arith.constant dense<0.000000e+00> : vector<8x32xf32>
    %169 = tpu.matmul %166, %168, %cst_87 {dimension_numbers = #tpu.dot_dimension_numbers<[1], [0], [0], [1], [0, 0, 1, 1], [], []>} : vector<8x32xbf16>, vector<32x32xbf16>, vector<8x32xf32> -> vector<8x32xf32>
    %c1_88 = arith.constant 1 : index
    %c0_89 = arith.constant 0 : index
    %c0_90 = arith.constant 0 : index
    %170 = vector.load %arg6[%c1_88, %c0_89, %c0_90] : memref<2x1x32xf32, #tpu.memory_space<vmem>>, vector<1x1x32xf32>
    %171 = vector.shape_cast %170 : vector<1x1x32xf32> to vector<1x32xf32>
    %172 = vector.broadcast %171 : vector<1x32xf32> to vector<8x32xf32>
    %173 = arith.addf %169, %172 : vector<8x32xf32>
    %c1_91 = arith.constant 1 : index
    %c0_92 = arith.constant 0 : index
    %c0_93 = arith.constant 0 : index
    %174 = vector.load %arg7[%c1_91, %c0_92, %c0_93] : memref<2x32x32xbf16, #tpu.memory_space<vmem>>, vector<1x32x32xbf16>
    %175 = vector.shape_cast %174 : vector<1x32x32xbf16> to vector<32x32xbf16>
    %cst_94 = arith.constant dense<0.000000e+00> : vector<8x32xf32>
    %176 = tpu.matmul %166, %175, %cst_94 {dimension_numbers = #tpu.dot_dimension_numbers<[1], [0], [0], [1], [0, 0, 1, 1], [], []>} : vector<8x32xbf16>, vector<32x32xbf16>, vector<8x32xf32> -> vector<8x32xf32>
    %c1_95 = arith.constant 1 : index
    %c0_96 = arith.constant 0 : index
    %c0_97 = arith.constant 0 : index
    %177 = vector.load %arg8[%c1_95, %c0_96, %c0_97] : memref<2x1x32xf32, #tpu.memory_space<vmem>>, vector<1x1x32xf32>
    %178 = vector.shape_cast %177 : vector<1x1x32xf32> to vector<1x32xf32>
    %179 = vector.broadcast %178 : vector<1x32xf32> to vector<8x32xf32>
    %180 = arith.addf %176, %179 : vector<8x32xf32>
    %c1_98 = arith.constant 1 : index
    %c0_99 = arith.constant 0 : index
    %c0_100 = arith.constant 0 : index
    %181 = vector.load %arg9[%c1_98, %c0_99, %c0_100] : memref<2x32x32xbf16, #tpu.memory_space<vmem>>, vector<1x32x32xbf16>
    %182 = vector.shape_cast %181 : vector<1x32x32xbf16> to vector<32x32xbf16>
    %cst_101 = arith.constant dense<0.000000e+00> : vector<8x32xf32>
    %183 = tpu.matmul %166, %182, %cst_101 {dimension_numbers = #tpu.dot_dimension_numbers<[1], [0], [0], [1], [0, 0, 1, 1], [], []>} : vector<8x32xbf16>, vector<32x32xbf16>, vector<8x32xf32> -> vector<8x32xf32>
    %c1_102 = arith.constant 1 : index
    %c0_103 = arith.constant 0 : index
    %c0_104 = arith.constant 0 : index
    %184 = vector.load %arg10[%c1_102, %c0_103, %c0_104] : memref<2x1x32xf32, #tpu.memory_space<vmem>>, vector<1x1x32xf32>
    %185 = vector.shape_cast %184 : vector<1x1x32xf32> to vector<1x32xf32>
    %186 = vector.broadcast %185 : vector<1x32xf32> to vector<8x32xf32>
    %187 = arith.addf %183, %186 : vector<8x32xf32>
    %188 = vector.shape_cast %173 : vector<8x32xf32> to vector<8x4x8xf32>
    %189 = tpu.transpose %188, [1, 0, 2] : vector<8x4x8xf32> -> vector<4x8x8xf32>
    %190 = arith.truncf %189 : vector<4x8x8xf32> to vector<4x8x8xbf16>
    %191 = vector.shape_cast %180 : vector<8x32xf32> to vector<8x4x8xf32>
    %192 = tpu.transpose %191, [1, 0, 2] : vector<8x4x8xf32> -> vector<4x8x8xf32>
    %193 = arith.truncf %192 : vector<4x8x8xf32> to vector<4x8x8xbf16>
    %194 = vector.shape_cast %187 : vector<8x32xf32> to vector<8x4x8xf32>
    %195 = tpu.transpose %194, [1, 0, 2] : vector<8x4x8xf32> -> vector<4x8x8xf32>
    %196 = arith.truncf %195 : vector<4x8x8xf32> to vector<4x8x8xbf16>
    "tpu.trace_start"() <{level = 10 : i32, message = "hqd,hkd->hqk"}> : () -> ()
    %cst_105 = arith.constant dense<0.000000e+00> : vector<4x8x8xf32>
    %197 = tpu.matmul %190, %193, %cst_105 {dimension_numbers = #tpu.dot_dimension_numbers<[2], [2], [1], [1], [0, 0, 0, 1, 1, 1], [0], [0]>} : vector<4x8x8xbf16>, vector<4x8x8xbf16>, vector<4x8x8xf32> -> vector<4x8x8xf32>
    "tpu.trace_stop"() : () -> ()
    %198 = vector.broadcast %26 : vector<1x1x8xf32> to vector<4x8x8xf32>
    %199 = arith.addf %197, %198 : vector<4x8x8xf32>
    %cst_106 = arith.constant dense<0xFF800000> : vector<4x8xf32>
    %200 = vector.multi_reduction <maximumf>, %199, %cst_106 [2] : vector<4x8x8xf32> to vector<4x8xf32>
    %201 = vector.shape_cast %200 : vector<4x8xf32> to vector<4x8x1xf32>
    %202 = vector.broadcast %201 : vector<4x8x1xf32> to vector<4x8x8xf32>
    %203 = arith.subf %199, %202 : vector<4x8x8xf32>
    %204 = math.exp %203 : vector<4x8x8xf32>
    %cst_107 = arith.constant dense<0.000000e+00> : vector<4x8xf32>
    %205 = vector.multi_reduction <add>, %204, %cst_107 [2] : vector<4x8x8xf32> to vector<4x8xf32>
    %206 = vector.shape_cast %205 : vector<4x8xf32> to vector<4x8x1xf32>
    %207 = tpu.reciprocal %206 {approx = true} : vector<4x8x1xf32> -> vector<4x8x1xf32>
    %208 = vector.broadcast %207 : vector<4x8x1xf32> to vector<4x8x8xf32>
    %209 = arith.mulf %204, %208 : vector<4x8x8xf32>
    %210 = arith.truncf %209 : vector<4x8x8xf32> to vector<4x8x8xbf16>
    "tpu.trace_start"() <{level = 10 : i32, message = "hqk,hkd->hqd"}> : () -> ()
    %cst_108 = arith.constant dense<0.000000e+00> : vector<4x8x8xf32>
    %211 = tpu.matmul %210, %196, %cst_108 {dimension_numbers = #tpu.dot_dimension_numbers<[2], [1], [1], [2], [0, 0, 0, 1, 1, 2], [0], [0]>} : vector<4x8x8xbf16>, vector<4x8x8xbf16>, vector<4x8x8xf32> -> vector<4x8x8xf32>
    "tpu.trace_stop"() : () -> ()
    %212 = tpu.transpose %211, [1, 0, 2] : vector<4x8x8xf32> -> vector<8x4x8xf32>
    %213 = vector.shape_cast %212 : vector<8x4x8xf32> to vector<8x32xf32>
    %214 = arith.truncf %213 : vector<8x32xf32> to vector<8x32xbf16>
    %c1_109 = arith.constant 1 : index
    %c0_110 = arith.constant 0 : index
    %c0_111 = arith.constant 0 : index
    %215 = vector.load %arg11[%c1_109, %c0_110, %c0_111] : memref<2x32x32xbf16, #tpu.memory_space<vmem>>, vector<1x32x32xbf16>
    %216 = vector.shape_cast %215 : vector<1x32x32xbf16> to vector<32x32xbf16>
    %cst_112 = arith.constant dense<0.000000e+00> : vector<8x32xf32>
    %217 = tpu.matmul %214, %216, %cst_112 {dimension_numbers = #tpu.dot_dimension_numbers<[1], [0], [0], [1], [0, 0, 1, 1], [], []>} : vector<8x32xbf16>, vector<32x32xbf16>, vector<8x32xf32> -> vector<8x32xf32>
    %c1_113 = arith.constant 1 : index
    %c0_114 = arith.constant 0 : index
    %c0_115 = arith.constant 0 : index
    %218 = vector.load %arg12[%c1_113, %c0_114, %c0_115] : memref<2x1x32xf32, #tpu.memory_space<vmem>>, vector<1x1x32xf32>
    %219 = vector.shape_cast %218 : vector<1x1x32xf32> to vector<1x32xf32>
    %220 = vector.broadcast %219 : vector<1x32xf32> to vector<8x32xf32>
    %221 = arith.addf %217, %220 : vector<8x32xf32>
    %222 = arith.addf %165, %221 : vector<8x32xf32>
    %c1_116 = arith.constant 1 : index
    %c0_117 = arith.constant 0 : index
    %c0_118 = arith.constant 0 : index
    %223 = vector.load %arg13[%c1_116, %c0_117, %c0_118] : memref<2x1x32xf32, #tpu.memory_space<vmem>>, vector<1x1x32xf32>
    %224 = vector.shape_cast %223 : vector<1x1x32xf32> to vector<1x32xf32>
    %c1_119 = arith.constant 1 : index
    %c0_120 = arith.constant 0 : index
    %c0_121 = arith.constant 0 : index
    %225 = vector.load %arg14[%c1_119, %c0_120, %c0_121] : memref<2x1x32xf32, #tpu.memory_space<vmem>>, vector<1x1x32xf32>
    %226 = vector.shape_cast %225 : vector<1x1x32xf32> to vector<1x32xf32>
    %cst_122 = arith.constant dense<0.000000e+00> : vector<8xf32>
    %227 = vector.multi_reduction <add>, %222, %cst_122 [1] : vector<8x32xf32> to vector<8xf32>
    %228 = vector.shape_cast %227 : vector<8xf32> to vector<8x1xf32>
    %cst_123 = arith.constant 3.200000e+01 : f32
    %229 = vector.broadcast %cst_123 : f32 to vector<8x1xf32>
    %230 = arith.divf %228, %229 : vector<8x1xf32>
    %231 = arith.mulf %222, %222 : vector<8x32xf32>
    %cst_124 = arith.constant dense<0.000000e+00> : vector<8xf32>
    %232 = vector.multi_reduction <add>, %231, %cst_124 [1] : vector<8x32xf32> to vector<8xf32>
    %233 = vector.shape_cast %232 : vector<8xf32> to vector<8x1xf32>
    %cst_125 = arith.constant 3.200000e+01 : f32
    %234 = vector.broadcast %cst_125 : f32 to vector<8x1xf32>
    %235 = arith.divf %233, %234 : vector<8x1xf32>
    %236 = arith.mulf %230, %230 : vector<8x1xf32>
    %237 = arith.subf %235, %236 : vector<8x1xf32>
    %238 = vector.broadcast %230 : vector<8x1xf32> to vector<8x32xf32>
    %239 = arith.subf %222, %238 : vector<8x32xf32>
    %cst_126 = arith.constant 9.99999996E-13 : f32
    %240 = vector.broadcast %cst_126 : f32 to vector<8x1xf32>
    %241 = arith.addf %237, %240 : vector<8x1xf32>
    %242 = math.rsqrt %241 : vector<8x1xf32>
    %243 = vector.broadcast %242 : vector<8x1xf32> to vector<8x32xf32>
    %244 = arith.mulf %239, %243 : vector<8x32xf32>
    %245 = vector.broadcast %224 : vector<1x32xf32> to vector<8x32xf32>
    %246 = arith.mulf %244, %245 : vector<8x32xf32>
    %247 = vector.broadcast %226 : vector<1x32xf32> to vector<8x32xf32>
    %248 = arith.addf %246, %247 : vector<8x32xf32>
    %249 = arith.truncf %248 : vector<8x32xf32> to vector<8x32xbf16>
    %c1_127 = arith.constant 1 : index
    %c0_128 = arith.constant 0 : index
    %c0_129 = arith.constant 0 : index
    %250 = vector.load %arg15[%c1_127, %c0_128, %c0_129] : memref<2x32x64xbf16, #tpu.memory_space<vmem>>, vector<1x32x64xbf16>
    %251 = vector.shape_cast %250 : vector<1x32x64xbf16> to vector<32x64xbf16>
    %cst_130 = arith.constant dense<0.000000e+00> : vector<8x64xf32>
    %252 = tpu.matmul %249, %251, %cst_130 {dimension_numbers = #tpu.dot_dimension_numbers<[1], [0], [0], [1], [0, 0, 1, 1], [], []>} : vector<8x32xbf16>, vector<32x64xbf16>, vector<8x64xf32> -> vector<8x64xf32>
    %c1_131 = arith.constant 1 : index
    %c0_132 = arith.constant 0 : index
    %c0_133 = arith.constant 0 : index
    %253 = vector.load %arg16[%c1_131, %c0_132, %c0_133] : memref<2x1x64xf32, #tpu.memory_space<vmem>>, vector<1x1x64xf32>
    %254 = vector.shape_cast %253 : vector<1x1x64xf32> to vector<1x64xf32>
    %255 = vector.broadcast %254 : vector<1x64xf32> to vector<8x64xf32>
    %256 = arith.addf %252, %255 : vector<8x64xf32>
    %257 = arith.mulf %256, %256 : vector<8x64xf32>
    %258 = arith.mulf %256, %257 : vector<8x64xf32>
    %cst_134 = arith.constant 4.471500e-02 : f32
    %259 = vector.broadcast %cst_134 : f32 to vector<8x64xf32>
    %260 = arith.mulf %259, %258 : vector<8x64xf32>
    %261 = arith.addf %256, %260 : vector<8x64xf32>
    %cst_135 = arith.constant 0.797884583 : f32
    %262 = vector.broadcast %cst_135 : f32 to vector<8x64xf32>
    %263 = arith.mulf %262, %261 : vector<8x64xf32>
    %264 = math.tanh %263 : vector<8x64xf32>
    %cst_136 = arith.constant 1.000000e+00 : f32
    %265 = vector.broadcast %cst_136 : f32 to vector<8x64xf32>
    %266 = arith.addf %265, %264 : vector<8x64xf32>
    %cst_137 = arith.constant 5.000000e-01 : f32
    %267 = vector.broadcast %cst_137 : f32 to vector<8x64xf32>
    %268 = arith.mulf %267, %266 : vector<8x64xf32>
    %269 = arith.mulf %256, %268 : vector<8x64xf32>
    %270 = arith.truncf %269 : vector<8x64xf32> to vector<8x64xbf16>
    %c1_138 = arith.constant 1 : index
    %c0_139 = arith.constant 0 : index
    %c0_140 = arith.constant 0 : index
    %271 = vector.load %arg17[%c1_138, %c0_139, %c0_140] : memref<2x64x32xbf16, #tpu.memory_space<vmem>>, vector<1x64x32xbf16>
    %272 = vector.shape_cast %271 : vector<1x64x32xbf16> to vector<64x32xbf16>
    %cst_141 = arith.constant dense<0.000000e+00> : vector<8x32xf32>
    %273 = tpu.matmul %270, %272, %cst_141 {dimension_numbers = #tpu.dot_dimension_numbers<[1], [0], [0], [1], [0, 0, 1, 1], [], []>} : vector<8x64xbf16>, vector<64x32xbf16>, vector<8x32xf32> -> vector<8x32xf32>
    %c1_142 = arith.constant 1 : index
    %c0_143 = arith.constant 0 : index
    %c0_144 = arith.constant 0 : index
    %274 = vector.load %arg18[%c1_142, %c0_143, %c0_144] : memref<2x1x32xf32, #tpu.memory_space<vmem>>, vector<1x1x32xf32>
    %275 = vector.shape_cast %274 : vector<1x1x32xf32> to vector<1x32xf32>
    %276 = vector.broadcast %275 : vector<1x32xf32> to vector<8x32xf32>
    %277 = arith.addf %273, %276 : vector<8x32xf32>
    %278 = arith.addf %248, %277 : vector<8x32xf32>
    %c1_145 = arith.constant 1 : index
    %c0_146 = arith.constant 0 : index
    %c0_147 = arith.constant 0 : index
    %279 = vector.load %arg19[%c1_145, %c0_146, %c0_147] : memref<2x1x32xf32, #tpu.memory_space<vmem>>, vector<1x1x32xf32>
    %280 = vector.shape_cast %279 : vector<1x1x32xf32> to vector<1x32xf32>
    %c1_148 = arith.constant 1 : index
    %c0_149 = arith.constant 0 : index
    %c0_150 = arith.constant 0 : index
    %281 = vector.load %arg20[%c1_148, %c0_149, %c0_150] : memref<2x1x32xf32, #tpu.memory_space<vmem>>, vector<1x1x32xf32>
    %282 = vector.shape_cast %281 : vector<1x1x32xf32> to vector<1x32xf32>
    %cst_151 = arith.constant dense<0.000000e+00> : vector<8xf32>
    %283 = vector.multi_reduction <add>, %278, %cst_151 [1] : vector<8x32xf32> to vector<8xf32>
    %284 = vector.shape_cast %283 : vector<8xf32> to vector<8x1xf32>
    %cst_152 = arith.constant 3.200000e+01 : f32
    %285 = vector.broadcast %cst_152 : f32 to vector<8x1xf32>
    %286 = arith.divf %284, %285 : vector<8x1xf32>
    %287 = arith.mulf %278, %278 : vector<8x32xf32>
    %cst_153 = arith.constant dense<0.000000e+00> : vector<8xf32>
    %288 = vector.multi_reduction <add>, %287, %cst_153 [1] : vector<8x32xf32> to vector<8xf32>
    %289 = vector.shape_cast %288 : vector<8xf32> to vector<8x1xf32>
    %cst_154 = arith.constant 3.200000e+01 : f32
    %290 = vector.broadcast %cst_154 : f32 to vector<8x1xf32>
    %291 = arith.divf %289, %290 : vector<8x1xf32>
    %292 = arith.mulf %286, %286 : vector<8x1xf32>
    %293 = arith.subf %291, %292 : vector<8x1xf32>
    %294 = vector.broadcast %286 : vector<8x1xf32> to vector<8x32xf32>
    %295 = arith.subf %278, %294 : vector<8x32xf32>
    %cst_155 = arith.constant 9.99999996E-13 : f32
    %296 = vector.broadcast %cst_155 : f32 to vector<8x1xf32>
    %297 = arith.addf %293, %296 : vector<8x1xf32>
    %298 = math.rsqrt %297 : vector<8x1xf32>
    %299 = vector.broadcast %298 : vector<8x1xf32> to vector<8x32xf32>
    %300 = arith.mulf %295, %299 : vector<8x32xf32>
    %301 = vector.broadcast %280 : vector<1x32xf32> to vector<8x32xf32>
    %302 = arith.mulf %300, %301 : vector<8x32xf32>
    %303 = vector.broadcast %282 : vector<1x32xf32> to vector<8x32xf32>
    %304 = arith.addf %302, %303 : vector<8x32xf32>
    %305 = vector.extract_strided_slice %304 {offsets = [0, 0], sizes = [1, 32], strides = [1, 1]} : vector<8x32xf32> to vector<1x32xf32>
    %306 = arith.truncf %305 : vector<1x32xf32> to vector<1x32xbf16>
    %c0_156 = arith.constant 0 : index
    %c0_157 = arith.constant 0 : index
    %307 = vector.load %arg21[%c0_156, %c0_157] : memref<32x32xbf16, #tpu.memory_space<vmem>>, vector<32x32xbf16>
    %cst_158 = arith.constant dense<0.000000e+00> : vector<1x32xf32>
    %308 = tpu.matmul %306, %307, %cst_158 {dimension_numbers = #tpu.dot_dimension_numbers<[1], [0], [0], [1], [0, 0, 1, 1], [], []>} : vector<1x32xbf16>, vector<32x32xbf16>, vector<1x32xf32> -> vector<1x32xf32>
    %c0_159 = arith.constant 0 : index
    %c0_160 = arith.constant 0 : index
    %309 = vector.load %arg22[%c0_159, %c0_160] : memref<1x32xf32, #tpu.memory_space<vmem>>, vector<1x32xf32>
    %310 = arith.addf %308, %309 : vector<1x32xf32>
    %311 = math.tanh %310 : vector<1x32xf32>
    %312 = arith.truncf %311 : vector<1x32xf32> to vector<1x32xbf16>
    %c0_161 = arith.constant 0 : index
    %c0_162 = arith.constant 0 : index
    %313 = vector.load %arg23[%c0_161, %c0_162] : memref<32x4xbf16, #tpu.memory_space<vmem>>, vector<32x4xbf16>
    %cst_163 = arith.constant dense<0.000000e+00> : vector<1x4xf32>
    %314 = tpu.matmul %312, %313, %cst_163 {dimension_numbers = #tpu.dot_dimension_numbers<[1], [0], [0], [1], [0, 0, 1, 1], [], []>} : vector<1x32xbf16>, vector<32x4xbf16>, vector<1x4xf32> -> vector<1x4xf32>
    %c0_164 = arith.constant 0 : index
    %c0_165 = arith.constant 0 : index
    %c0_166 = arith.constant 0 : index
    %315 = vector.load %arg24[%c0_164, %c0_165, %c0_166] : memref<1x1x4xf32, #tpu.memory_space<vmem>>, vector<1x1x4xf32>
    %316 = vector.shape_cast %315 : vector<1x1x4xf32> to vector<1x4xf32>
    %317 = vector.shape_cast %314 : vector<1x4xf32> to vector<1x1x4xf32>
    tpu.vector_store %arg24[%c0_164, %c0_165, %c0_166], %317 {strides = array<i32>} : memref<1x1x4xf32, #tpu.memory_space<vmem>>, vector<1x1x4xf32>,
    return
  }
  func.func @transform_0(%arg0: i32) -> (i32, i32, i32) {
    %c0_i32 = arith.constant 0 : i32
    %c0_i32_0 = arith.constant 0 : i32
    %c0_i32_1 = arith.constant 0 : i32
    return %arg0, %c0_i32, %c0_i32_0 : i32, i32, i32
  }
  func.func @transform_1(%arg0: i32) -> (i32, i32, i32) {
    %c0_i32 = arith.constant 0 : i32
    %c0_i32_0 = arith.constant 0 : i32
    %c0_i32_1 = arith.constant 0 : i32
    return %arg0, %c0_i32, %c0_i32_0 : i32, i32, i32
  }
  func.func @transform_2(%arg0: i32) -> (i32, i32) {
    %c0_i32 = arith.constant 0 : i32
    %c0_i32_0 = arith.constant 0 : i32
    %c0_i32_1 = arith.constant 0 : i32
    return %c0_i32, %c0_i32_0 : i32, i32
  }
  func.func @transform_3(%arg0: i32) -> (i32, i32) {
    %c0_i32 = arith.constant 0 : i32
    %c0_i32_0 = arith.constant 0 : i32
    %c0_i32_1 = arith.constant 0 : i32
    return %c0_i32, %c0_i32_0 : i32, i32
  }
  func.func @transform_4(%arg0: i32) -> (i32, i32, i32) {
    %c0_i32 = arith.constant 0 : i32
    %c0_i32_0 = arith.constant 0 : i32
    %c0_i32_1 = arith.constant 0 : i32
    %c0_i32_2 = arith.constant 0 : i32
    return %c0_i32, %c0_i32_0, %c0_i32_1 : i32, i32, i32
  }
  func.func @transform_5(%arg0: i32) -> (i32, i32, i32) {
    %c0_i32 = arith.constant 0 : i32
    %c0_i32_0 = arith.constant 0 : i32
    %c0_i32_1 = arith.constant 0 : i32
    %c0_i32_2 = arith.constant 0 : i32
    return %c0_i32, %c0_i32_0, %c0_i32_1 : i32, i32, i32
  }
  func.func @transform_6(%arg0: i32) -> (i32, i32, i32) {
    %c0_i32 = arith.constant 0 : i32
    %c0_i32_0 = arith.constant 0 : i32
    %c0_i32_1 = arith.constant 0 : i32
    %c0_i32_2 = arith.constant 0 : i32
    return %c0_i32, %c0_i32_0, %c0_i32_1 : i32, i32, i32
  }
  func.func @transform_7(%arg0: i32) -> (i32, i32, i32) {
    %c0_i32 = arith.constant 0 : i32
    %c0_i32_0 = arith.constant 0 : i32
    %c0_i32_1 = arith.constant 0 : i32
    %c0_i32_2 = arith.constant 0 : i32
    return %c0_i32, %c0_i32_0, %c0_i32_1 : i32, i32, i32
  }
  func.func @transform_8(%arg0: i32) -> (i32, i32, i32) {
    %c0_i32 = arith.constant 0 : i32
    %c0_i32_0 = arith.constant 0 : i32
    %c0_i32_1 = arith.constant 0 : i32
    %c0_i32_2 = arith.constant 0 : i32
    return %c0_i32, %c0_i32_0, %c0_i32_1 : i32, i32, i32
  }
  func.func @transform_9(%arg0: i32) -> (i32, i32, i32) {
    %c0_i32 = arith.constant 0 : i32
    %c0_i32_0 = arith.constant 0 : i32
    %c0_i32_1 = arith.constant 0 : i32
    %c0_i32_2 = arith.constant 0 : i32
    return %c0_i32, %c0_i32_0, %c0_i32_1 : i32, i32, i32
  }
  func.func @transform_10(%arg0: i32) -> (i32, i32, i32) {
    %c0_i32 = arith.constant 0 : i32
    %c0_i32_0 = arith.constant 0 : i32
    %c0_i32_1 = arith.constant 0 : i32
    %c0_i32_2 = arith.constant 0 : i32
    return %c0_i32, %c0_i32_0, %c0_i32_1 : i32, i32, i32
  }
  func.func @transform_11(%arg0: i32) -> (i32, i32, i32) {
    %c0_i32 = arith.constant 0 : i32
    %c0_i32_0 = arith.constant 0 : i32
    %c0_i32_1 = arith.constant 0 : i32
    %c0_i32_2 = arith.constant 0 : i32
    return %c0_i32, %c0_i32_0, %c0_i32_1 : i32, i32, i32
  }
  func.func @transform_12(%arg0: i32) -> (i32, i32, i32) {
    %c0_i32 = arith.constant 0 : i32
    %c0_i32_0 = arith.constant 0 : i32
    %c0_i32_1 = arith.constant 0 : i32
    %c0_i32_2 = arith.constant 0 : i32
    return %c0_i32, %c0_i32_0, %c0_i32_1 : i32, i32, i32
  }
  func.func @transform_13(%arg0: i32) -> (i32, i32, i32) {
    %c0_i32 = arith.constant 0 : i32
    %c0_i32_0 = arith.constant 0 : i32
    %c0_i32_1 = arith.constant 0 : i32
    %c0_i32_2 = arith.constant 0 : i32
    return %c0_i32, %c0_i32_0, %c0_i32_1 : i32, i32, i32
  }
  func.func @transform_14(%arg0: i32) -> (i32, i32, i32) {
    %c0_i32 = arith.constant 0 : i32
    %c0_i32_0 = arith.constant 0 : i32
    %c0_i32_1 = arith.constant 0 : i32
    %c0_i32_2 = arith.constant 0 : i32
    return %c0_i32, %c0_i32_0, %c0_i32_1 : i32, i32, i32
  }
  func.func @transform_15(%arg0: i32) -> (i32, i32, i32) {
    %c0_i32 = arith.constant 0 : i32
    %c0_i32_0 = arith.constant 0 : i32
    %c0_i32_1 = arith.constant 0 : i32
    %c0_i32_2 = arith.constant 0 : i32
    return %c0_i32, %c0_i32_0, %c0_i32_1 : i32, i32, i32
  }
  func.func @transform_16(%arg0: i32) -> (i32, i32, i32) {
    %c0_i32 = arith.constant 0 : i32
    %c0_i32_0 = arith.constant 0 : i32
    %c0_i32_1 = arith.constant 0 : i32
    %c0_i32_2 = arith.constant 0 : i32
    return %c0_i32, %c0_i32_0, %c0_i32_1 : i32, i32, i32
  }
  func.func @transform_17(%arg0: i32) -> (i32, i32, i32) {
    %c0_i32 = arith.constant 0 : i32
    %c0_i32_0 = arith.constant 0 : i32
    %c0_i32_1 = arith.constant 0 : i32
    %c0_i32_2 = arith.constant 0 : i32
    return %c0_i32, %c0_i32_0, %c0_i32_1 : i32, i32, i32
  }
  func.func @transform_18(%arg0: i32) -> (i32, i32, i32) {
    %c0_i32 = arith.constant 0 : i32
    %c0_i32_0 = arith.constant 0 : i32
    %c0_i32_1 = arith.constant 0 : i32
    %c0_i32_2 = arith.constant 0 : i32
    return %c0_i32, %c0_i32_0, %c0_i32_1 : i32, i32, i32
  }
  func.func @transform_19(%arg0: i32) -> (i32, i32, i32) {
    %c0_i32 = arith.constant 0 : i32
    %c0_i32_0 = arith.constant 0 : i32
    %c0_i32_1 = arith.constant 0 : i32
    %c0_i32_2 = arith.constant 0 : i32
    return %c0_i32, %c0_i32_0, %c0_i32_1 : i32, i32, i32
  }
  func.func @transform_20(%arg0: i32) -> (i32, i32) {
    %c0_i32 = arith.constant 0 : i32
    %c0_i32_0 = arith.constant 0 : i32
    %c0_i32_1 = arith.constant 0 : i32
    return %c0_i32, %c0_i32_0 : i32, i32
  }
  func.func @transform_21(%arg0: i32) -> (i32, i32) {
    %c0_i32 = arith.constant 0 : i32
    %c0_i32_0 = arith.constant 0 : i32
    %c0_i32_1 = arith.constant 0 : i32
    return %c0_i32, %c0_i32_0 : i32, i32
  }
  func.func @transform_22(%arg0: i32) -> (i32, i32) {
    %c0_i32 = arith.constant 0 : i32
    %c0_i32_0 = arith.constant 0 : i32
    %c0_i32_1 = arith.constant 0 : i32
    return %c0_i32, %c0_i32_0 : i32, i32
  }
  func.func @transform_23(%arg0: i32) -> (i32, i32, i32) {
    %c0_i32 = arith.constant 0 : i32
    %c0_i32_0 = arith.constant 0 : i32
    %c0_i32_1 = arith.constant 0 : i32
    return %arg0, %c0_i32, %c0_i32_0 : i32, i32, i32
  }
}

</mosaic_0001>

<bundles_post_ra>
// kernel: forward.1
= control target key start
LH: loop header
LB: loop body
LE: loop exit
PB: predicated region body
PF: predicated region fallthrough
CT: control target
= control target key end

     0   :  { %s5420_s0 = inlined_call_operand.vmem [shape: f32[2,8,32], index: 0, kind: input, shape index: {}]   ;;  %s5421_s1 = inlined_call_operand.vmem [shape: f32[2,1,8], index: 1, kind: input, shape index: {}]   ;;  %s5422_s2 = inlined_call_operand.vmem [shape: f32[1,32], index: 2, kind: input, shape index: {}]   ;;  %s5423_s3 = inlined_call_operand.vmem [shape: f32[1,32], index: 3, kind: input, shape index: {}]   ;;  %s5424_s4 = inlined_call_operand.vmem [shape: bf16[2,32,32], index: 4, kind: input, shape index: {}]   ;;  %s5425_s5 = inlined_call_operand.vmem [shape: f32[2,1,32], index: 5, kind: input, shape index: {}]   ;;  %s5426_s6 = inlined_call_operand.vmem [shape: bf16[2,32,32], index: 6, kind: input, shape index: {}]   ;;  %s5427_s7 = inlined_call_operand.vmem [shape: f32[2,1,32], index: 7, kind: input, shape index: {}]   ;;  %s5428_s8 = inlined_call_operand.vmem [shape: bf16[2,32,32], index: 8, kind: input, shape index: {}]   ;;  %s5429_s9 = inlined_call_operand.vmem [shape: f32[2,1,32], index: 9, kind: input, shape index: {}]   ;;  %s5430_s10 = inlined_call_operand.vmem [shape: bf16[2,32,32], index: 10, kind: input, shape index: {}]   ;;  %s5431_s11 = inlined_call_operand.vmem [shape: f32[2,1,32], index: 11, kind: input, shape index: {}]   ;;  %s5432_s12 = inlined_call_operand.vmem [shape: f32[2,1,32], index: 12, kind: input, shape index: {}]   ;;  %s5433_s13 = inlined_call_operand.vmem [shape: f32[2,1,32], index: 13, kind: input, shape index: {}]   ;;  %s5434_s14 = inlined_call_operand.vmem [shape: bf16[2,32,64], index: 14, kind: input, shape index: {}]   ;;  %s5435_s15 = inlined_call_operand.vmem [shape: f32[2,1,64], index: 15, kind: input, shape index: {}]   ;;  %s5436_s16 = inlined_call_operand.vmem [shape: bf16[2,64,32], index: 16, kind: input, shape index: {}]   ;;  %s5437_s17 = inlined_call_operand.vmem [shape: f32[2,1,32], index: 17, kind: input, shape index: {}]   ;;  %s5438_s18 = inlined_call_operand.vmem [shape: f32[2,1,32], index: 18, kind: input, shape index: {}]   ;;  %s5439_s19 = inlined_call_operand.vmem [shape: f32[2,1,32], index: 19, kind: input, shape index: {}]   ;;  %s5440_s20 = inlined_call_operand.vmem [shape: bf16[32,32], index: 20, kind: input, shape index: {}]   ;;  %s5441_s21 = inlined_call_operand.vmem [shape: f32[1,32], index: 21, kind: input, shape index: {}]   ;;  %s5442_s22 = inlined_call_operand.vmem [shape: bf16[32,4], index: 22, kind: input, shape index: {}]   ;;  %s5443_s23 = inlined_call_operand.hbm [shape: f32[2,1,4], index: 23, kind: output, shape index: {}]  }
   0x1   :  { %5463 = sst [smem:[#allocation11_spill]] %s5420_s0 }
   0x2   :  { %5464 = sst [smem:[#allocation12_spill]] %s5421_s1 }
   0x3   :  { %5465 = sst [smem:[#allocation13_spill]] %s5422_s2 }
   0x4   :  { %5466 = sst [smem:[#allocation14_spill]] %s5423_s3 }
   0x5   :  { %5467 = sst [smem:[#allocation15_spill]] %s5424_s4 }
   0x6   :  { %5468 = sst [smem:[#allocation16_spill]] %s5425_s5 }
   0x7   :  { %5469 = sst [smem:[#allocation17_spill]] %s5426_s6 }
   0x8   :  { %5470 = sst [smem:[#allocation18_spill]] %s5427_s7 }
   0x9   :  { %5471 = sst [smem:[#allocation19_spill]] %s5428_s8 }
   0xa   :  { %5472 = sst [smem:[#allocation20_spill]] %s5443_s23 }
   0xb   :  { %28 = vsyncpa [#allocation3], 0 }
   0xc   :  { %30 = vsyncpa [#allocation3 + $0x1], 0  ;;  %s4748_s4 = smov 0   ;;  %s4750_s30 = smov 0  }
   0xd   :  { %s4752_s24 = smov 0   ;;  %s4754_s25 = smov 0  }
   0xe LB: > { %5473 = sst [smem:[#allocation5_spill]] %s4603_s4  ;;  %s4769_s5 = sadd.s32 4294967295, %s4615_s25   ;;  %s4615_s25 = sphi %s4754_s25, %s5501_s25   ;;  %s4611_s24 = sphi %s4752_s24, %s5503_s24   ;;  %s4607_s30 = sphi %s4750_s30, %s5505_s30   ;;  %s4603_s4 = sphi %s4748_s4, %s5504_s4  }
   0xf   : > { %5474 = sst [smem:[#allocation6_spill]] %s4611_s24  ;;  %s3983_s1 = sadd.s32 4294967294, %s4615_s25  }
  0x10   : > { %5475 = sst [smem:[#allocation7_spill]] %s4615_s25  ;;  %s4773_s26 = sadd.s32 1, %s4615_s25  }
  0x11   : > { %5476 = sst [smem:[#allocation8_spill]] %s4773_s26  ;;  %s536_s2 = sadd.s32 1, %s4611_s24 }
  0x12   : > { %s533_s6 = ssub.s32 %s4615_s25, %s4773_s26  ;;  %p546_p0 = scmp.ne.s32.totalorder %s4611_s24, %s4607_s30 }
  0x13   : > { %p534_p1 = scmp.eq.s32.totalorder %s533_s6, 0  ;;  %p547_p2 = scmp.eq.s32.totalorder %s4769_s5, 1 }
  0x14   : > { %p552_p3 = scmp.ne.s32.totalorder %s4607_s30, %s4603_s4  ;;  %p553_p4 = scmp.eq.s32.totalorder %s3983_s1, 1 }
  0x15   : > { %s4784_s27 = scalar_select %p534_p1, %s4611_s24, %s536_s2  }
  0x16   : > { %p4786_p5 = por %p547_p2, %p546_p0  ;;  %p4790_p6 = por %p553_p4, %p552_p3 }
  0x17   : > { %5477 = sst [smem:[#allocation9_spill]] %s4784_s27  ;;  %p3986_p7 = scmp.ge.s32.totalorder %s4615_s25, 1 }
  0x18   : > { %s5479_s28 = scalar_select %p4790_p6, 1, 0 }
  0x19   : > { %p647_p8 = scmp.lt.s32.totalorder %s4615_s25, 3 }
  0x1a   : > { %5480 = sst [smem:[#allocation10_spill]] %s5479_s28 }
  0x1b   : > { %p648_p9 = pnand %p3986_p7, %p647_p8 }
  0x1c   : > { %p712_p10 = scmp.lt.s32.totalorder (!%p648_p9), %s4769_s5, 1  ;;  %vm723_vm0 = vcmask (!%p648_p9), 261120   ;;  %s5481_s2 = sld [smem:[#allocation11_spill]] (!%p648_p9)  ;;  %v4617_v6 = vmov (!%p648_p9), 0.0   ;;  %vm4618_vm1 = vmmov (!%p648_p9), 0   ;;  %v963_v44 = vlaneseq (!%p648_p9) }
  0x1d   : > { %651 = sbr.rel (%p648_p9) target bundleno = 5303 (0x14b7), region = 112  ;;  %s5482_s26 = sld [smem:[#allocation15_spill]] (!%p648_p9)  ;;  %4208 = vmatprep.subr.bf16.mxu0 (!%p648_p9), %v4617_v6  ;;  %4216 = vmatprep.subr.bf16.mxu1 (!%p648_p9), %v4617_v6  ;;  %v4622_v42 = vmov (!%p648_p9), 1983009808   ;;  %v4623_v45 = vmov (!%p648_p9), 1934713408  }
  0x1e   : > { %s5483_s25 = sld [smem:[#allocation17_spill]] (!%p648_p9)  ;;  %4212 = vmatprep.mubr.msk.bf16.mxu0 (!%p648_p9), %vm4618_vm1, %v4617_v6  ;;  %4220 = vmatprep.mubr.msk.bf16.mxu1 (!%p648_p9), %vm4618_vm1, %v4617_v6  ;;  %s5487_s8 = sld [smem:[#allocation19_spill]] (!%p648_p9)  ;;  %v961_v43 = vunpack.c.l.s4 (!%p648_p9), %v4622_v42  ;;  %v993_v46 = vunpack.c.l.s4 (!%p648_p9), %v4623_v45  ;;  %v964_v48 = vshrl.u32 (!%p648_p9), %v963_v44, 7  ;;  %vm1404_vm2 = vcmask (!%p648_p9), 64512  }
  0x1f   : > { %s5458_s28 = smov (!%p648_p9), 104   ;;  %s5490_s1 = sld [smem:[#allocation16_spill]] (!%p648_p9)  ;;  %vm1640_vm3 = vcmask (!%p648_p9), 1043456   ;;  %vm1971_vm4 = vcmask (!%p648_p9), 130048   ;;  %vm1973_vm5 = vcmask (!%p648_p9), 195584   ;;  %vm2190_vm6 = vcmask (!%p648_p9), 523264  }
  0x20   : > { %v962_v47 = vunpack.c.0.s8 (!%p648_p9), %v961_v43  ;;  %v994_v51 = vunpack.c.0.s8 (!%p648_p9), %v993_v46  ;;  %s5456_s0 = smov (!%p648_p9), 8   ;;  %s5455_s4 = smov (!%p648_p9), 24   ;;  %vm3904_vm7 = vcmask (!%p648_p9), 24576  }
  0x22   : > { %v4869_v52 = vsub.s32 (!%p648_p9), %v962_v47, %v964_v48  ;;  %v4871_v58 = vsub.s32 (!%p648_p9), %v994_v51, %v964_v48 }
  0x23   : > { %v4473_v4 = vld [vmem:[%s5482_s26] sm:$0xff] (!%p648_p9)   ;;  %v4475_v7 = vld [vmem:[%s5482_s26 + $0x8] sm:$0xff] (!%p648_p9)  }
  0x24   : > { %s4798_s29 = scalar_select %p712_p10, %s4769_s5, 1  ;;  %v4474_v5 = vld [vmem:[%s5483_s25] sm:$0xff]   ;;  %4209 = vmatpush3.bf16.msra.mxu0 %v4473_v4  ;;  %v4478_v25 = vld [vmem:[%s5487_s8 + $0x8] sm:$0xff]  }
  0x25   : > { %s5484_s23 = smov %s5483_s25  ;;  %4217 = vmatpush3.bf16.msra.mxu1 %v4474_v5  ;;  %4210 = vmatprep.subr.bf16.mxu0 %v4617_v6  ;;  %s5485_s25 = sld [smem:[#allocation13_spill]]  ;;  %v4477_v23 = vld [vmem:[%s5487_s8] sm:$0xff]  }
  0x26   : > { %s3987_s3 = sshll.u32 %s4798_s29, 3  ;;  %v4476_v8 = vld [vmem:[%s5484_s23 + $0x8] sm:$0xff]   ;;  %4218 = vmatprep.subr.bf16.mxu1 %v4617_v6  ;;  %v3990_v36 = vld [vmem:[%s5490_s1] ss:$0 sm:$0xff] }
  0x27   : > { %s715_s6 = scalar_lea.vmem %s5481_s2, %s3987_s3  ;;  %s4621_s2 = smov 112  }
  0x28   : > { %v720_v0 = vld [vmem:[%s715_s6] sm:$0xff]  ;;  %4211 = vmatpush3.bf16.msra.mxu0 %v4475_v7  ;;  %s5486_s6 = sld [smem:[#allocation14_spill]] }
  0x29   : > { %v724_v1 = vsel %vm723_vm0, %v720_v0, 0.0  ;;  %v729_v2 = vmul.f32 %v720_v0, %v720_v0  ;;  %4219 = vmatpush3.bf16.msra.mxu1 %v4476_v8  ;;  %4224 = vmatprep.subr.bf16.mxu0 %v4617_v6 }
  0x2a   : > { %725 = vadd.xlane.f32.xlu0 %v724_v1  ;;  %4232 = vmatprep.subr.bf16.mxu1 %v4617_v6 }
  0x2b   : > { %v730_v3 = vsel %vm723_vm0, %v729_v2, 0.0  ;;  %v3988_v18 = vld [vmem:[%s5485_s25] ss:$0 sm:$0xff]  ;;  %s5488_s25 = sld [smem:[#allocation18_spill]] }
  0x2e   : > { %731 = vadd.xlane.f32.xlu0 %v730_v3  ;;  %v3989_v20 = vld [vmem:[%s5486_s6] ss:$0 sm:$0xff]  ;;  %s5460_s6 = smov 120  }
  0x31   : > { %s5489_s27 = smov %s5488_s25  ;;  %v3994_v26 = vld [vmem:[%s5488_s25] ss:$0 sm:$0xff]  ;;  %s5491_s25 = sld [smem:[#allocation12_spill]] }
  0x37   : > { %s718_s3 = scalar_lea.vmem %s5491_s25, %s4798_s29  ;;  %s5457_s29 = smov 16  }
  0xb7   : > { %v726_v9 = vpop.xlane.xlu0 %725 }
  0xb8   : > { %v728_v10 = vmul.f32 0.03125, %v726_v9 }
  0xba   : > { %v734_v12 = vmul.f32 %v728_v10, %v728_v10  ;;  %v736_v16 = vsub.f32 %v720_v0, %v728_v10 }
  0xbb   : > { %v732_v11 = vpop.xlane.xlu0 %731 }
  0xbc   : > { %v733_v13 = vmul.f32 0.03125, %v732_v11 }
  0xbe   : > { %v735_v14 = vsub.f32 %v733_v13, %v734_v12 }
  0xc0   : > { %v737_v15 = vadd.f32 1e-12, %v735_v14 }
  0xc2   : > { %4505 = vrsqrt.f32 %v737_v15 }
  0xcc   : > { %v4506_v17 = vpop.eup %4505 }
  0xcd   : > { %v739_v19 = vmul.f32 %v4506_v17, %v736_v16 }
  0xcf   : > { %v746_v21 = vmul.f32 %v3988_v18, %v739_v19 }
  0xd1   : > { %v4834_v22 = vadd.f32 %v3989_v20, %v746_v21 }
  0xd3   : > { %v755_v24 = vpack.c.bf16 %v4834_v22, %v4834_v22 }
  0xd5   : > { %4213 = vmatmul.mubr.msk.bf16.vlgmr.msra.gmra.mrb[0].mxu0 %vm723_vm0, %v755_v24  ;;  %4221 = vmatmul.mubr.msk.bf16.vlgmr.msra.gmra.mrb[0].mxu1 %vm723_vm0, %v755_v24 }
  0xd6   : > { %4225 = vmatpush3.bf16.msra.mxu0 %v4477_v23  ;;  %4228 = vmatprep.mubr.msk.bf16.mxu0 %vm4618_vm1, %v4617_v6 }
  0xd7   : > { %4226 = vmatprep.subr.bf16.mxu0 %v4617_v6  ;;  %4234 = vmatprep.mubr.msk.bf16.mxu1 %vm4618_vm1, %v4617_v6 }
  0xda   : > { %4227 = vmatpush3.bf16.msra.mxu0 %v4478_v25 }
  0xdb   : > { %4238 = vmatprep.subr.bf16.mxu0 %v4617_v6 }
  0xdd   : > { %4229 = vmatmul.mubr.msk.bf16.vlgmr.msra.gmra.mrb[4].mxu0 %vm723_vm0, %v755_v24 }
  0xde   : > { %4240 = vmatprep.mubr.msk.bf16.mxu0 %vm4618_vm1, %v4617_v6 }
 0x1a8   : > { %v816_v27 = vpop.f32.mrb[0].mxu0  ;;  %v879_v28 = vpop.f32.mrb[0].mxu1 }
 0x1a9   : > { %v880_v29 = vadd.f32 %v3994_v26, %v879_v28  ;;  %v4214_v30 = vpop.f32.mrb[1].mxu0  ;;  %v4222_v31 = vpop.f32.mrb[1].mxu1  ;;  %v817_v38 = vadd.f32 %v3990_v36, %v816_v27 }
 0x1aa   : > { %v819_v32 = vpop.f32.mrb[2].mxu0  ;;  %v882_v33 = vpop.f32.mrb[2].mxu1 }
 0x1ab   : > { %1105 = vrot.lane.b32.xlu0 %v880_v29, %s5458_s28  ;;  %1099 = vrot.lane.b32.xlu1 %v880_v29, %s5460_s6  ;;  %v4215_v34 = vpop.f32.mrb[3].mxu0  ;;  %v4223_v35 = vpop.f32.mrb[3].mxu1 }
 0x1af   : > { %1102 = vrot.lane.b32.xlu1 %v880_v29, %s4621_s2 }
 0x1b0   : > { %v4864_v37 = vpop.f32.mrb[4].mxu0 }
 0x1b1   : > { %v4230_v39 = vpop.f32.mrb[5].mxu0 }
 0x1b2   : > { %v945_v40 = vpop.f32.mrb[6].mxu0 }
 0x1b3   : > { %949 = vrot.lane.b32.xlu1 %v817_v38, %s5460_s6  ;;  %v4231_v41 = vpop.f32.mrb[7].mxu0 }
 0x1b7   : > { %952 = vrot.lane.b32.xlu1 %v817_v38, %s4621_s2 }
 0x1bb   : > { %955 = vrot.lane.b32.xlu1 %v817_v38, %s5458_s28 }
 0x21d   : > { %v1106_v49 = vpop.permute.xlu0 %1105  ;;  %v1100_v50 = vpop.permute.xlu1 %1099 }
 0x21e   : > { %v1124_v53 = vcombine.low %v1100_v50, %v1106_v49  ;;  %v1125_v54 = vcombine.high %v1100_v50, %v1106_v49 }
 0x220   : > { %v1132_v59 = vrot.slane %v1124_v53, %v4869_v52  ;;  %v1139_v60 = vrot.slane %v1125_v54, %v4869_v52 }
 0x221   : > { %v1103_v55 = vpop.permute.xlu1 %1102 }
 0x222   : > { %v1108_v56 = vcombine.low %v880_v29, %v1103_v55  ;;  %v1109_v57 = vcombine.high %v880_v29, %v1103_v55 }
 0x224   : > { %v1116_v61 = vrot.slane %v1108_v56, %v4869_v52  ;;  %v1123_v62 = vrot.slane %v1109_v57, %v4869_v52 }
 0x225   : > { %v950_v63 = vpop.permute.xlu1 %949 }
 0x226   : > { %v1140_v0 = vcombine.low %v1116_v61, %v1132_v59  ;;  %v1141_v1 = vcombine.high %v1116_v61, %v1132_v59  ;;  %v1156_v2 = vcombine.low %v1123_v62, %v1139_v60  ;;  %v1157_v3 = vcombine.high %v1123_v62, %v1139_v60 }
 0x228   : > { %v1148_v4 = vrot.slane %v1140_v0, %v4871_v58  ;;  %v1155_v5 = vrot.slane %v1141_v1, %v4871_v58  ;;  %v1164_v7 = vrot.slane %v1156_v2, %v4871_v58  ;;  %v1171_v8 = vrot.slane %v1157_v3, %v4871_v58 }
 0x229   : > { %v953_v9 = vpop.permute.xlu1 %952 }
 0x22a   : > { %v1176_v10 = vcombine.low %v1148_v4, %v1155_v5  ;;  %v4004_v11 = vcombine.high %v1148_v4, %v1155_v5  ;;  %v1192_v12 = vcombine.low %v1164_v7, %v1171_v8  ;;  %v4005_v13 = vcombine.high %v1164_v7, %v1171_v8 }
 0x22b   : > { %v958_v14 = vcombine.low %v817_v38, %v953_v9  ;;  %v959_v15 = vcombine.high %v817_v38, %v953_v9 }
 0x22c   : > { %v1183_v16 = vrot.slane %v1176_v10, %v4869_v52  ;;  %v1191_v17 = vrot.slane %v4004_v11, %v4869_v52  ;;  %v1199_v18 = vrot.slane %v1192_v12, %v4869_v52  ;;  %v1207_v19 = vrot.slane %v4005_v13, %v4869_v52 }
 0x22d   : > { %v956_v20 = vpop.permute.xlu1 %955  ;;  %v966_v26 = vrot.slane %v958_v14, %v4869_v52  ;;  %v973_v27 = vrot.slane %v959_v15, %v4869_v52 }
 0x22e   : > { %v974_v21 = vcombine.low %v950_v63, %v956_v20  ;;  %v975_v23 = vcombine.high %v950_v63, %v956_v20  ;;  %v1208_v24 = vcombine.low %v1183_v16, %v1191_v17  ;;  %v1224_v25 = vcombine.low %v1199_v18, %v1207_v19  ;;  %v4929_v20 = vld [vmem:[%s718_s3] ss:$0 sm:$0xff]  ;;  %s4127_s3 = sshll.u32 %s4769_s5, 4  ;;  %s4627_s5 = smov [#allocation2]  }
 0x22f   : > { %v1209_v32 = vcombine.high %v1183_v16, %v1191_v17  ;;  %v1225_v33 = vcombine.high %v1199_v18, %v1207_v19 }
 0x230   : > { %v982_v28 = vrot.slane %v974_v21, %v4869_v52  ;;  %v989_v29 = vrot.slane %v975_v23, %v4869_v52  ;;  %v1216_v30 = vrot.slane %v1208_v24, %v4871_v58  ;;  %v1232_v31 = vrot.slane %v1224_v25, %v4871_v58 }
 0x231   : > { %v1223_v47 = vrot.slane %v1209_v32, %v4871_v58  ;;  %v1239_v48 = vrot.slane %v1225_v33, %v4871_v58 }
 0x232   : > { %v990_v34 = vcombine.low %v966_v26, %v982_v28  ;;  %v991_v35 = vcombine.high %v966_v26, %v982_v28  ;;  %v1006_v36 = vcombine.low %v973_v27, %v989_v29  ;;  %v1007_v38 = vcombine.high %v973_v27, %v989_v29 }
 0x233   : > { %v1240_v39 = vcombine.low %v1216_v30, %v1232_v31  ;;  %v1241_v40 = vcombine.high %v1216_v30, %v1232_v31  ;;  %v1242_v63 = vcombine.low %v1223_v47, %v1239_v48  ;;  %v1243_v0 = vcombine.high %v1223_v47, %v1239_v48  ;;  %v3998_v47 = vld [vmem:[%s5429_s9] ss:$0 sm:$0xff] }
 0x234   : > { %v998_v41 = vrot.slane %v990_v34, %v4871_v58  ;;  %v1005_v42 = vrot.slane %v991_v35, %v4871_v58  ;;  %v1014_v43 = vrot.slane %v1006_v36, %v4871_v58  ;;  %v1021_v44 = vrot.slane %v1007_v38, %v4871_v58 }
 0x235   : > { %v1244_v45 = vpack.c.bf16 %v1240_v39, %v1240_v39  ;;  %v1245_v46 = vpack.c.bf16 %v1241_v40, %v1241_v40  ;;  %v1246_v8 = vpack.c.bf16 %v1242_v63, %v1242_v63  ;;  %v1247_v9 = vpack.c.bf16 %v1243_v0, %v1243_v0 }
 0x236   : > { %v1026_v49 = vcombine.low %v998_v41, %v1005_v42  ;;  %v4002_v50 = vcombine.high %v998_v41, %v1005_v42  ;;  %v1042_v51 = vcombine.low %v1014_v43, %v1021_v44  ;;  %v4003_v53 = vcombine.high %v1014_v43, %v1021_v44 }
 0x237   : > { %v1409_v54 = vsel %vm1404_vm2, %v1244_v45, 0  ;;  %v1455_v55 = vsel %vm1404_vm2, %v1245_v46, 0  ;;  %v1501_v14 = vsel %vm1404_vm2, %v1246_v8, 0  ;;  %v1547_v15 = vsel %vm1404_vm2, %v1247_v9, 0 }
 0x238   : > { %v1033_v56 = vrot.slane %v1026_v49, %v4869_v52  ;;  %v1041_v57 = vrot.slane %v4002_v50, %v4869_v52  ;;  %v1049_v59 = vrot.slane %v1042_v51, %v4869_v52  ;;  %v1057_v60 = vrot.slane %v4003_v53, %v4869_v52  ;;  %4233 = vmatpush3.bf16.xpose.msra.mxu1 %v1409_v54 }
 0x239   : > { %4239 = vmatpush3.bf16.xpose.msra.mxu0 %v1455_v55  ;;  %4244 = vmatprep.subr.bf16.mxu1 %v4617_v6  ;;  %v943_v48 = vadd.f32 %v3998_v47, %v4864_v37 }
 0x23a   : > { %v1058_v61 = vcombine.low %v1033_v56, %v1041_v57  ;;  %v1074_v62 = vcombine.low %v1049_v59, %v1057_v60  ;;  %4250 = vmatprep.subr.bf16.mxu0 %v4617_v6  ;;  %v1059_v1 = vcombine.high %v1033_v56, %v1041_v57  ;;  %v1075_v2 = vcombine.high %v1049_v59, %v1057_v60 }
 0x23c   : > { %v1066_v3 = vrot.slane %v1058_v61, %v4871_v58  ;;  %v1082_v4 = vrot.slane %v1074_v62, %v4871_v58  ;;  %v1073_v12 = vrot.slane %v1059_v1, %v4871_v58  ;;  %v1089_v13 = vrot.slane %v1075_v2, %v4871_v58 }
 0x23e   : > { %v1090_v5 = vcombine.low %v1066_v3, %v1082_v4  ;;  %v1091_v7 = vcombine.high %v1066_v3, %v1082_v4  ;;  %v1092_v16 = vcombine.low %v1073_v12, %v1089_v13  ;;  %v1093_v17 = vcombine.high %v1073_v12, %v1089_v13 }
 0x240   : > { %v1094_v10 = vpack.c.bf16 %v1090_v5, %v1090_v5  ;;  %v1095_v11 = vpack.c.bf16 %v1091_v7, %v1091_v7  ;;  %v1096_v18 = vpack.c.bf16 %v1092_v16, %v1092_v16  ;;  %v1097_v19 = vpack.c.bf16 %v1093_v17, %v1093_v17 }
 0x242   : > { %4235 = vmatmul.mubr.msk.bf16.vlgmr.msra.gmra.mrb[4].mxu1 %vm1404_vm2, %v1094_v10  ;;  %4241 = vmatmul.mubr.msk.bf16.vlgmr.msra.gmra.mrb[8].mxu0 %vm1404_vm2, %v1095_v11 }
 0x243   : > { %4245 = vmatpush3.bf16.xpose.msra.mxu1 %v1501_v14  ;;  %4251 = vmatpush3.bf16.xpose.msra.mxu0 %v1547_v15 }
 0x244   : > { %4246 = vmatprep.mubr.msk.bf16.mxu1 %vm4618_vm1, %v4617_v6  ;;  %4252 = vmatprep.mubr.msk.bf16.mxu0 %vm4618_vm1, %v4617_v6 }
 0x245   : > { %4256 = vmatprep.subr.bf16.mxu1 %v4617_v6  ;;  %4262 = vmatprep.subr.bf16.mxu0 %v4617_v6 }
 0x24a   : > { %4247 = vmatmul.mubr.msk.bf16.vlgmr.msra.gmra.mrb[8].mxu1 %vm1404_vm2, %v1096_v18  ;;  %4253 = vmatmul.mubr.msk.bf16.vlgmr.msra.gmra.mrb[12].mxu0 %vm1404_vm2, %v1097_v19 }
 0x24b   : > { %4258 = vmatprep.mubr.msk.bf16.mxu1 %vm4618_vm1, %v4617_v6  ;;  %4264 = vmatprep.mubr.msk.bf16.mxu0 %vm4618_vm1, %v4617_v6 }
 0x315   : > { %v1445_v21 = vpop.f32.mrb[4].mxu1  ;;  %v1491_v23 = vpop.f32.mrb[8].mxu0 }
 0x316   : > { %v1446_v24 = vadd.f32 %v4929_v20, %v1445_v21  ;;  %v1492_v25 = vadd.f32 %v4929_v20, %v1491_v23  ;;  %v4236_v26 = vpop.f32.mrb[5].mxu1  ;;  %v4242_v27 = vpop.f32.mrb[9].mxu0 }
 0x317   : > { %v1448_v28 = vpop.f32.mrb[6].mxu1  ;;  %v1494_v29 = vpop.f32.mrb[10].mxu0 }
 0x318   : > { %v4237_v30 = vpop.f32.mrb[7].mxu1  ;;  %v4243_v31 = vpop.f32.mrb[11].mxu0  ;;  %v1589_v32 = vsel %vm1404_vm2, %v1446_v24, -inf  ;;  %v1592_v33 = vsel %vm1404_vm2, %v1492_v25, -inf }
 0x319   : > { %1590 = vmax.xlane.f32.xlu1 %v1589_v32  ;;  %1593 = vmax.xlane.f32.xlu0 %v1592_v33 }
 0x31d   : > { %v1537_v34 = vpop.f32.mrb[8].mxu1  ;;  %v1583_v35 = vpop.f32.mrb[12].mxu0 }
 0x31e   : > { %v1538_v36 = vadd.f32 %v4929_v20, %v1537_v34  ;;  %v4248_v38 = vpop.f32.mrb[9].mxu1  ;;  %v4254_v39 = vpop.f32.mrb[13].mxu0  ;;  %v1584_v42 = vadd.f32 %v4929_v20, %v1583_v35 }
 0x31f   : > { %v1540_v40 = vpop.f32.mrb[10].mxu1  ;;  %v1586_v41 = vpop.f32.mrb[14].mxu0 }
 0x320   : > { %v4249_v43 = vpop.f32.mrb[11].mxu1  ;;  %v4255_v44 = vpop.f32.mrb[15].mxu0  ;;  %v1595_v45 = vsel %vm1404_vm2, %v1538_v36, -inf  ;;  %v1598_v46 = vsel %vm1404_vm2, %v1584_v42, -inf }
 0x321   : > { %1596 = vmax.xlane.f32.xlu1 %v1595_v45 }
 0x325   : > { %1599 = vmax.xlane.f32.xlu1 %v1598_v46 }
 0x336   : > { %1252 = vrot.lane.b32.xlu1 %v943_v48, %s4621_s2 }
 0x3a6   : > { %v1591_v49 = vpop.xlane.xlu1 %1590  ;;  %v1594_v50 = vpop.xlane.xlu0 %1593 }
 0x3a7   : > { %v1601_v51 = vsub.f32 %v1446_v24, %v1591_v49  ;;  %v1602_v53 = vsub.f32 %v1492_v25, %v1594_v50 }
 0x3a9   : > { %v1605_v54 = vmul.f32 1.442695, %v1601_v51  ;;  %v1607_v55 = vmul.f32 1.442695, %v1602_v53 }
 0x3ab   : > { %4507 = vpow2.f32 %v1605_v54 }
 0x3ac   : > { %4509 = vpow2.f32 %v1607_v55 }
 0x3ae   : > { %v1597_v60 = vpop.xlane.xlu1 %1596 }
 0x3af   : > { %v1603_v62 = vsub.f32 %v1538_v36, %v1597_v60 }
 0x3b1   : > { %v1609_v0 = vmul.f32 1.442695, %v1603_v62 }
 0x3b2   : > { %v1600_v61 = vpop.xlane.xlu1 %1599 }
 0x3b3   : > { %v1604_v63 = vsub.f32 %v1584_v42, %v1600_v61  ;;  %4511 = vpow2.f32 %v1609_v0 }
 0x3b5   : > { %v4944_v56 = vpop.eup %4507  ;;  %v1611_v1 = vmul.f32 1.442695, %v1604_v63 }
 0x3b6   : > { %v4946_v57 = vpop.eup %4509  ;;  %v1613_v59 = vsel %vm1404_vm2, %v4944_v56, 0.0  ;;  %v1253_v7 = vpop.permute.xlu1 %1252 }
 0x3b7   : > { %1614 = vadd.xlane.f32.xlu0 %v1613_v59  ;;  %v1616_v37 = vsel %vm1404_vm2, %v4946_v57, 0.0  ;;  %4513 = vpow2.f32 %v1611_v1  ;;  %v1258_v10 = vcombine.low %v943_v48, %v1253_v7  ;;  %v1259_v11 = vcombine.high %v943_v48, %v1253_v7 }
 0x3b8   : > { %1617 = vadd.xlane.f32.xlu1 %v1616_v37 }
 0x3b9   : > { %v1266_v16 = vrot.slane %v1258_v10, %v4869_v52  ;;  %v1273_v17 = vrot.slane %v1259_v11, %v4869_v52 }
 0x3bd   : > { %v4954_v2 = vpop.eup %4511 }
 0x3be   : > { %v1619_v4 = vsel %vm1404_vm2, %v4954_v2, 0.0 }
 0x3c1   : > { %v4956_v3 = vpop.eup %4513 }
 0x3c2   : > { %v1622_v5 = vsel %vm1404_vm2, %v4956_v3, 0.0 }
 0x3c9   : > { %1255 = vrot.lane.b32.xlu1 %v943_v48, %s5458_s28  ;;  %s710_s28 = sand.u32 1, %s4607_s30  }
 0x3cd   : > { %1249 = vrot.lane.b32.xlu0 %v943_v48, %s5460_s6 }
 0x3ec   : > { %1620 = vadd.xlane.f32.xlu0 %v1619_v4 }
 0x3ed   : > { %1623 = vadd.xlane.f32.xlu1 %v1622_v5 }
 0x444   : > { %v1615_v8 = vpop.xlane.xlu0 %1614 }
 0x445   : > { %v1618_v9 = vpop.xlane.xlu1 %1617  ;;  %4515 = vrcp.f32 %v1615_v8 }
 0x446   : > { %4517 = vrcp.f32 %v1618_v9 }
 0x448   : > { %v1250_v12 = vpop.permute.xlu0 %1249 }
 0x449   : > { %v1256_v13 = vpop.permute.xlu1 %1255 }
 0x44a   : > { %v1274_v14 = vcombine.low %v1250_v12, %v1256_v13  ;;  %v1275_v15 = vcombine.high %v1250_v12, %v1256_v13 }
 0x44c   : > { %v1282_v18 = vrot.slane %v1274_v14, %v4869_v52  ;;  %v1289_v19 = vrot.slane %v1275_v15, %v4869_v52 }
 0x44e   : > { %v1290_v21 = vcombine.low %v1266_v16, %v1282_v18  ;;  %v1291_v23 = vcombine.high %v1266_v16, %v1282_v18  ;;  %v1306_v24 = vcombine.low %v1273_v17, %v1289_v19  ;;  %v1307_v25 = vcombine.high %v1273_v17, %v1289_v19 }
 0x44f   : > { %v4516_v45 = vpop.eup %4515 }
 0x450   : > { %v1298_v26 = vrot.slane %v1290_v21, %v4871_v58  ;;  %v1305_v27 = vrot.slane %v1291_v23, %v4871_v58  ;;  %v1314_v28 = vrot.slane %v1306_v24, %v4871_v58  ;;  %v1321_v29 = vrot.slane %v1307_v25, %v4871_v58  ;;  %v4518_v48 = vpop.eup %4517 }
 0x451   : > { %v1629_v54 = vmul.f32 %v4516_v45, %v4944_v56  ;;  %v1630_v55 = vmul.f32 %v4518_v48, %v4946_v57 }
 0x452   : > { %v1326_v30 = vcombine.low %v1298_v26, %v1305_v27  ;;  %v4006_v31 = vcombine.high %v1298_v26, %v1305_v27  ;;  %v1342_v32 = vcombine.low %v1314_v28, %v1321_v29  ;;  %v4007_v33 = vcombine.high %v1314_v28, %v1321_v29 }
 0x453   : > { %v1633_v0 = vpack.c.bf16 %v1629_v54, %v1629_v54  ;;  %v1634_v1 = vpack.c.bf16 %v1630_v55, %v1630_v55 }
 0x454   : > { %v1333_v34 = vrot.slane %v1326_v30, %v4869_v52  ;;  %v1341_v35 = vrot.slane %v4006_v31, %v4869_v52  ;;  %v1349_v36 = vrot.slane %v1342_v32, %v4869_v52  ;;  %v1357_v38 = vrot.slane %v4007_v33, %v4869_v52 }
 0x456   : > { %v1358_v39 = vcombine.low %v1333_v34, %v1341_v35  ;;  %v1359_v40 = vcombine.high %v1333_v34, %v1341_v35  ;;  %v1374_v41 = vcombine.low %v1349_v36, %v1357_v38  ;;  %v1375_v42 = vcombine.high %v1349_v36, %v1357_v38 }
 0x458   : > { %v1366_v43 = vrot.slane %v1358_v39, %v4871_v58  ;;  %v1373_v44 = vrot.slane %v1359_v40, %v4871_v58  ;;  %v1382_v46 = vrot.slane %v1374_v41, %v4871_v58  ;;  %v1389_v47 = vrot.slane %v1375_v42, %v4871_v58  ;;  %v4479_v42 = vld [vmem:[%s5430_s10] sm:$0xff]  }
 0x45a   : > { %v1390_v49 = vcombine.low %v1366_v43, %v1382_v46  ;;  %v1391_v50 = vcombine.high %v1366_v43, %v1382_v46  ;;  %v1392_v51 = vcombine.low %v1373_v44, %v1389_v47  ;;  %v1393_v53 = vcombine.high %v1373_v44, %v1389_v47 }
 0x45c   : > { %v1394_v59 = vpack.c.bf16 %v1390_v49, %v1390_v49  ;;  %v1395_v37 = vpack.c.bf16 %v1391_v50, %v1391_v50  ;;  %v1396_v62 = vpack.c.bf16 %v1392_v51, %v1392_v51  ;;  %v1397_v63 = vpack.c.bf16 %v1393_v53, %v1393_v53  ;;  %v4480_v51 = vld [vmem:[%s5430_s10 + $0x8] sm:$0xff]  }
 0x45e   : > { %v1642_v60 = vsel %vm1640_vm3, %v1394_v59, 0  ;;  %v1688_v61 = vsel %vm1640_vm3, %v1395_v37, 0  ;;  %v1734_v56 = vsel %vm1640_vm3, %v1396_v62, 0  ;;  %v1780_v57 = vsel %vm1640_vm3, %v1397_v63, 0 }
 0x45f   : > { %4257 = vmatpush3.bf16.msra.mxu1 %v1642_v60  ;;  %4263 = vmatpush3.bf16.msra.mxu0 %v1688_v61 }
 0x460   : > { %4268 = vmatprep.subr.bf16.mxu1 %v4617_v6  ;;  %4274 = vmatprep.subr.bf16.mxu0 %v4617_v6 }
 0x462   : > { %4259 = vmatmul.mubr.msk.bf16.vlgmr.msra.gmra.mrb[12].mxu1 %vm1404_vm2, %v1633_v0  ;;  %4265 = vmatmul.mubr.msk.bf16.vlgmr.msra.gmra.mrb[16].mxu0 %vm1404_vm2, %v1634_v1 }
 0x463   : > { %4269 = vmatpush3.bf16.msra.mxu1 %v1734_v56  ;;  %4275 = vmatpush3.bf16.msra.mxu0 %v1780_v57 }
 0x464   : > { %4270 = vmatprep.mubr.msk.bf16.mxu1 %vm4618_vm1, %v4617_v6  ;;  %4276 = vmatprep.mubr.msk.bf16.mxu0 %vm4618_vm1, %v4617_v6 }
 0x465   : > { %4280 = vmatprep.subr.bf16.mxu1 %v4617_v6  ;;  %4288 = vmatprep.subr.bf16.mxu0 %v4617_v6 }
 0x479   : > { %v1621_v4 = vpop.xlane.xlu0 %1620 }
 0x47a   : > { %4519 = vrcp.f32 %v1621_v4  ;;  %v1624_v5 = vpop.xlane.xlu1 %1623 }
 0x47b   : > { %4521 = vrcp.f32 %v1624_v5 }
 0x484   : > { %v4520_v7 = vpop.eup %4519 }
 0x485   : > { %v4522_v8 = vpop.eup %4521  ;;  %v1631_v9 = vmul.f32 %v4520_v7, %v4954_v2 }
 0x486   : > { %v1632_v10 = vmul.f32 %v4522_v8, %v4956_v3 }
 0x487   : > { %v1635_v11 = vpack.c.bf16 %v1631_v9, %v1631_v9 }
 0x488   : > { %v1636_v12 = vpack.c.bf16 %v1632_v10, %v1632_v10 }
 0x489   : > { %4271 = vmatmul.mubr.msk.bf16.vlgmr.msra.gmra.mrb[16].mxu1 %vm1404_vm2, %v1635_v11 }
 0x48a   : > { %4277 = vmatmul.mubr.msk.bf16.vlgmr.msra.gmra.mrb[20].mxu0 %vm1404_vm2, %v1636_v12  ;;  %4284 = vmatprep.mubr.msk.bf16.mxu1 %vm4618_vm1, %v4617_v6 }
 0x48b   : > { %4292 = vmatprep.mubr.msk.bf16.mxu0 %vm4618_vm1, %v4617_v6  ;;  %4281 = vmatpush3.bf16.msra.mxu1 %v4479_v42  ;;  %v4483_v42 = vld [vmem:[%s5436_s16] sm:$0xff]  }
 0x48c   : > { %4282 = vmatprep.subr.bf16.mxu1 %v4617_v6 }
 0x48f   : > { %4283 = vmatpush3.bf16.msra.mxu1 %v4480_v51 }
 0x490   : > { %4296 = vmatprep.subr.bf16.mxu1 %v4617_v6 }
 0x535   : > { %v1678_v13 = vpop.f32.mrb[12].mxu1  ;;  %v1724_v14 = vpop.f32.mrb[16].mxu0 }
 0x536   : > { %v4260_v15 = vpop.f32.mrb[13].mxu1  ;;  %v4266_v16 = vpop.f32.mrb[17].mxu0 }
 0x537   : > { %v1681_v17 = vpop.f32.mrb[14].mxu1  ;;  %v1727_v2 = vpop.f32.mrb[18].mxu0  ;;  %v4019_v15 = vld [vmem:[%s5431_s11] ss:$0 sm:$0xff] }
 0x538   : > { %v4261_v18 = vpop.f32.mrb[15].mxu1  ;;  %v4267_v3 = vpop.f32.mrb[19].mxu0 }
 0x55c   : > { %v1770_v19 = vpop.f32.mrb[16].mxu1 }
 0x55d   : > { %v1822_v21 = vcombine.low %v1678_v13, %v1770_v19  ;;  %v1823_v23 = vcombine.high %v1678_v13, %v1770_v19  ;;  %v1816_v24 = vpop.f32.mrb[20].mxu0  ;;  %v4272_v25 = vpop.f32.mrb[17].mxu1 }
 0x55e   : > { %v1838_v26 = vcombine.low %v1724_v14, %v1816_v24  ;;  %v1839_v27 = vcombine.high %v1724_v14, %v1816_v24  ;;  %v4278_v28 = vpop.f32.mrb[21].mxu0  ;;  %v1773_v29 = vpop.f32.mrb[18].mxu1  ;;  %v4481_v25 = vld [vmem:[%s5434_s14] sm:$0xff]  }
 0x55f   : > { %v1830_v30 = vrot.slane %v1822_v21, %v4869_v52  ;;  %v1837_v31 = vrot.slane %v1823_v23, %v4869_v52  ;;  %v1819_v32 = vpop.f32.mrb[22].mxu0  ;;  %v4273_v33 = vpop.f32.mrb[19].mxu1  ;;  %4289 = vmatpush3.bf16.msra.mxu0 %v4481_v25  ;;  %v4035_v25 = vld [vmem:[%s5438_s18] ss:$0 sm:$0xff] }
 0x560   : > { %v1846_v34 = vrot.slane %v1838_v26, %v4869_v52  ;;  %v1853_v35 = vrot.slane %v1839_v27, %v4869_v52  ;;  %v4279_v36 = vpop.f32.mrb[23].mxu0  ;;  %v4482_v26 = vld [vmem:[%s5434_s14 + $0x8] sm:$0xff]   ;;  %4290 = vmatprep.subr.bf16.mxu0 %v4617_v6 }
 0x562   : > { %v1854_v38 = vcombine.low %v1830_v30, %v1846_v34  ;;  %v1855_v39 = vcombine.high %v1830_v30, %v1846_v34  ;;  %v1870_v40 = vcombine.low %v1837_v31, %v1853_v35  ;;  %v1871_v41 = vcombine.high %v1837_v31, %v1853_v35  ;;  %v4023_v35 = vld [vmem:[%s5432_s12] ss:$0 sm:$0xff] }
 0x563   : > { %4291 = vmatpush3.bf16.msra.mxu0 %v4482_v26 }
 0x564   : > { %v1862_v43 = vrot.slane %v1854_v38, %v4871_v58  ;;  %v1869_v44 = vrot.slane %v1855_v39, %v4871_v58  ;;  %v1878_v45 = vrot.slane %v1870_v40, %v4871_v58  ;;  %v1885_v46 = vrot.slane %v1871_v41, %v4871_v58  ;;  %4308 = vmatprep.subr.bf16.mxu0 %v4617_v6  ;;  %v4024_v38 = vld [vmem:[%s5433_s13] ss:$0 sm:$0xff] }
 0x566   : > { %v1890_v47 = vcombine.low %v1862_v43, %v1869_v44  ;;  %v4017_v48 = vcombine.high %v1862_v43, %v1869_v44  ;;  %v1906_v49 = vcombine.low %v1878_v45, %v1885_v46  ;;  %v4018_v50 = vcombine.high %v1878_v45, %v1885_v46  ;;  %v4484_v43 = vld [vmem:[%s5436_s16 + $0x8] sm:$0xff]   ;;  %v4485_v44 = vld [vmem:[%s5436_s16 + $0x10] sm:$0xff]   ;;  %v4486_v45 = vld [vmem:[%s5436_s16 + $0x18] sm:$0xff]  }
 0x567   : > { %v4025_v46 = vld [vmem:[%s5435_s15] ss:$0 sm:$0xff] }
 0x568   : > { %v1897_v53 = vrot.slane %v1890_v47, %v4869_v52  ;;  %v1905_v54 = vrot.slane %v4017_v48, %v4869_v52  ;;  %v1913_v55 = vrot.slane %v1906_v49, %v4869_v52  ;;  %v1921_v59 = vrot.slane %v4018_v50, %v4869_v52 }
 0x56a   : > { %v1923_v37 = vcombine.high %v1897_v53, %v1905_v54  ;;  %v1939_v60 = vcombine.high %v1913_v55, %v1921_v59  ;;  %v1922_v61 = vcombine.low %v1897_v53, %v1905_v54  ;;  %v1938_v62 = vcombine.low %v1913_v55, %v1921_v59 }
 0x56c   : > { %v1937_v63 = vrot.slane %v1923_v37, %v4871_v58  ;;  %v1953_v0 = vrot.slane %v1939_v60, %v4871_v58  ;;  %v1930_v1 = vrot.slane %v1922_v61, %v4871_v58  ;;  %v1946_v56 = vrot.slane %v1938_v62, %v4871_v58 }
 0x56e   : > { %v1956_v57 = vcombine.low %v1937_v63, %v1953_v0  ;;  %v1955_v4 = vcombine.high %v1930_v1, %v1946_v56  ;;  %v1957_v5 = vcombine.high %v1937_v63, %v1953_v0  ;;  %v1954_v7 = vcombine.low %v1930_v1, %v1946_v56  ;;  %v4029_v1 = vld [vmem:[%s5437_s17] ss:$0 sm:$0xff] }
 0x570   : > { %1963 = vrot.lane.b32.xlu1 %v1956_v57, %s5457_s29  ;;  %1959 = vrot.lane.b32.xlu0 %v1955_v4, %s5456_s0  ;;  %s5492_s0 = smov 120   ;;  %s5494_s29 = smov 16  }
 0x574   : > { %1967 = vrot.lane.b32.xlu0 %v1957_v5, %s5455_s4  ;;  %s5493_s4 = smov 104  }
 0x5e2   : > { %v1960_v8 = vpop.permute.xlu0 %1959  ;;  %v1964_v9 = vpop.permute.xlu1 %1963 }
 0x5e3   : > { %v1970_v10 = vsel %vm1404_vm2, %v1954_v7, %v1960_v8 }
 0x5e4   : > { %v1972_v12 = vsel %vm1971_vm4, %v1970_v10, %v1964_v9 }
 0x5e6   : > { %v1968_v11 = vpop.permute.xlu0 %1967 }
 0x5e7   : > { %v1974_v13 = vsel %vm1973_vm5, %v1972_v12, %v1968_v11  ;;  %v4487_v12 = vld [vmem:[%s5482_s26 + $0x10] sm:$0xff]  }
 0x5e8   : > { %v1975_v14 = vpack.c.bf16 %v1974_v13, %v1974_v13  ;;  %v4488_v13 = vld [vmem:[%s5487_s8 + $0x10] sm:$0xff]  }
 0x5ea   : > { %4285 = vmatmul.mubr.msk.bf16.vlgmr.msra.gmra.mrb[20].mxu1 %vm723_vm0, %v1975_v14  ;;  %v4489_v14 = vld [vmem:[%s5482_s26 + $0x18] sm:$0xff]  }
 0x5eb   : > { %4304 = vmatprep.mubr.msk.bf16.mxu1 %vm4618_vm1, %v4617_v6  ;;  %4297 = vmatpush3.bf16.msra.mxu1 %v4483_v42 }
 0x5ec   : > { %4298 = vmatprep.subr.bf16.mxu1 %v4617_v6 }
 0x5ef   : > { %4299 = vmatpush3.bf16.msra.mxu1 %v4484_v43 }
 0x5f0   : > { %4300 = vmatprep.subr.bf16.mxu1 %v4617_v6 }
 0x5f3   : > { %4301 = vmatpush3.bf16.msra.mxu1 %v4485_v44 }
 0x5f4   : > { %4302 = vmatprep.subr.bf16.mxu1 %v4617_v6 }
 0x5f7   : > { %4303 = vmatpush3.bf16.msra.mxu1 %v4486_v45  ;;  %v4042_v45 = vld [vmem:[%s5490_s1 + $0x1] ss:$0 sm:$0xff] }
 0x5f8   : > { %4324 = vmatprep.subr.bf16.mxu1 %v4617_v6 }
 0x6bd   : > { %v2036_v16 = vpop.f32.mrb[20].mxu1 }
 0x6be   : > { %v2037_v17 = vadd.f32 %v4019_v15, %v2036_v16  ;;  %v4286_v2 = vpop.f32.mrb[21].mxu1  ;;  %v4490_v15 = vld [vmem:[%s5487_s8 + $0x18] sm:$0xff]   ;;  %s4557_s8 = sshll.u32 %s4627_s5, 4  ;;  %s4558_s8 = int_to_ptr.vmem [resolvable:$false] %s4557_s8 }
 0x6bf   : > { %v2039_v18 = vpop.f32.mrb[22].mxu1 }
 0x6c0   : > { %v2042_v3 = vadd.f32 %v2037_v17, %v4834_v22  ;;  %v4287_v19 = vpop.f32.mrb[23].mxu1 }
 0x6c2   : > { %v2045_v21 = vsel %vm723_vm0, %v2042_v3, 0.0  ;;  %v2049_v23 = vmul.f32 %v2042_v3, %v2042_v3 }
 0x6c3   : > { %2046 = vadd.xlane.f32.xlu1 %v2045_v21 }
 0x6c4   : > { %v2050_v24 = vsel %vm723_vm0, %v2049_v23, 0.0 }
 0x6c5   : > { %2051 = vadd.xlane.f32.xlu0 %v2050_v24 }
 0x750   : > { %v2047_v22 = vpop.xlane.xlu1 %2046 }
 0x751   : > { %v2048_v27 = vmul.f32 0.03125, %v2047_v22  ;;  %v4036_v22 = vld [vmem:[%s5439_s19] ss:$0 sm:$0xff] }
 0x752   : > { %v2052_v28 = vpop.xlane.xlu0 %2051 }
 0x753   : > { %v2054_v29 = vmul.f32 %v2048_v27, %v2048_v27  ;;  %v2053_v30 = vmul.f32 0.03125, %v2052_v28  ;;  %v2056_v33 = vsub.f32 %v2042_v3, %v2048_v27 }
 0x755   : > { %v2055_v31 = vsub.f32 %v2053_v30, %v2054_v29  ;;  %v4491_v29 = vld [vmem:[%s5484_s23 + $0x10] sm:$0xff]  }
 0x757   : > { %v2057_v32 = vadd.f32 1e-12, %v2055_v31  ;;  %v4492_v31 = vld [vmem:[%s5484_s23 + $0x18] sm:$0xff]  }
 0x759   : > { %4523 = vrsqrt.f32 %v2057_v32 }
 0x763   : > { %v4524_v34 = vpop.eup %4523 }
 0x764   : > { %v2059_v36 = vmul.f32 %v4524_v34, %v2056_v33 }
 0x766   : > { %v2066_v39 = vmul.f32 %v4023_v35, %v2059_v36 }
 0x768   : > { %v2073_v40 = vadd.f32 %v4024_v38, %v2066_v39 }
 0x76a   : > { %v2074_v41 = vpack.c.bf16 %v2073_v40, %v2073_v40 }
 0x76c   : > { %4293 = vmatmul.mubr.msk.bf16.vlgmr.msra.gmra.mrb[24].mxu0 %vm723_vm0, %v2074_v41  ;;  %v4051_v41 = vld [vmem:[%s5489_s27 + $0x1] ss:$0 sm:$0xff] }
 0x76d   : > { %4312 = vmatprep.mubr.msk.bf16.mxu0 %vm4618_vm1, %v4617_v6  ;;  %4309 = vmatpush3.bf16.msra.mxu0 %v4487_v12 }
 0x76e   : > { %4310 = vmatprep.subr.bf16.mxu0 %v4617_v6 }
 0x771   : > { %4311 = vmatpush3.bf16.msra.mxu0 %v4489_v14 }
 0x772   : > { %4316 = vmatprep.subr.bf16.mxu0 %v4617_v6 }
 0x83f   : > { %v2135_v47 = vpop.f32.mrb[24].mxu0 }
 0x840   : > { %v2136_v48 = vadd.f32 %v4025_v46, %v2135_v47  ;;  %v4294_v49 = vpop.f32.mrb[25].mxu0 }
 0x841   : > { %v2138_v50 = vpop.f32.mrb[26].mxu0 }
 0x842   : > { %v2141_v51 = vmul.f32 %v2136_v48, %v2136_v48  ;;  %v4295_v53 = vpop.f32.mrb[27].mxu0 }
 0x844   : > { %v2142_v54 = vmul.f32 %v2141_v51, %v2136_v48 }
 0x846   : > { %v2143_v55 = vmul.f32 0.044715, %v2142_v54 }
 0x848   : > { %v2144_v59 = vadd.f32 %v2143_v55, %v2136_v48 }
 0x84a   : > { %v2145_v37 = vmul.f32 0.7978846, %v2144_v59 }
 0x84c   : > { %4525 = vtanh.f32 %v2145_v37 }
 0x856   : > { %v4526_v60 = vpop.eup %4525 }
 0x857   : > { %v2147_v61 = vadd.f32 1.0, %v4526_v60 }
 0x859   : > { %v2148_v62 = vmul.f32 0.5, %v2147_v61 }
 0x85b   : > { %v2149_v63 = vmul.f32 %v2148_v62, %v2136_v48 }
 0x85d   : > { %v2150_v0 = vpack.c.bf16 %v2149_v63, %v2149_v63 }
 0x85f   : > { %4305 = vmatmul.mubr.msk.bf16.vlgmr.msra.gmra.mrb[24].mxu1 %vm2190_vm6, %v2150_v0 }
 0x860   : > { %4328 = vmatprep.mubr.msk.bf16.mxu1 %vm4618_vm1, %v4617_v6  ;;  %4325 = vmatpush3.bf16.msra.mxu1 %v4488_v13 }
 0x861   : > { %4326 = vmatprep.subr.bf16.mxu1 %v4617_v6 }
 0x864   : > { %4327 = vmatpush3.bf16.msra.mxu1 %v4490_v15 }
 0x865   : > { %4338 = vmatprep.subr.bf16.mxu1 %v4617_v6 }
 0x932   : > { %v2228_v56 = vpop.f32.mrb[24].mxu1 }
 0x933   : > { %v2229_v57 = vadd.f32 %v4029_v1, %v2228_v56  ;;  %v4306_v4 = vpop.f32.mrb[25].mxu1 }
 0x934   : > { %v2231_v5 = vpop.f32.mrb[26].mxu1 }
 0x935   : > { %v2234_v7 = vadd.f32 %v2229_v57, %v2073_v40  ;;  %v4307_v8 = vpop.f32.mrb[27].mxu1 }
 0x937   : > { %v2237_v9 = vsel %vm723_vm0, %v2234_v7, 0.0  ;;  %v2241_v10 = vmul.f32 %v2234_v7, %v2234_v7 }
 0x938   : > { %2238 = vadd.xlane.f32.xlu0 %v2237_v9 }
 0x939   : > { %v2242_v11 = vsel %vm723_vm0, %v2241_v10, 0.0 }
 0x93a   : > { %2243 = vadd.xlane.f32.xlu1 %v2242_v11 }
 0x9c5   : > { %v2239_v16 = vpop.xlane.xlu0 %2238 }
 0x9c6   : > { %v2240_v17 = vmul.f32 0.03125, %v2239_v16 }
 0x9c7   : > { %v2244_v2 = vpop.xlane.xlu1 %2243 }
 0x9c8   : > { %v2246_v18 = vmul.f32 %v2240_v17, %v2240_v17  ;;  %v2245_v3 = vmul.f32 0.03125, %v2244_v2  ;;  %v2248_v23 = vsub.f32 %v2234_v7, %v2240_v17 }
 0x9ca   : > { %v2247_v19 = vsub.f32 %v2245_v3, %v2246_v18 }
 0x9cc   : > { %v2249_v21 = vadd.f32 1e-12, %v2247_v19 }
 0x9ce   : > { %4527 = vrsqrt.f32 %v2249_v21 }
 0x9d8   : > { %v4528_v24 = vpop.eup %4527 }
 0x9d9   : > { %v2251_v26 = vmul.f32 %v4528_v24, %v2248_v23 }
 0x9db   : > { %v2258_v27 = vmul.f32 %v4035_v25, %v2251_v26 }
 0x9dd   : > { %v5107_v28 = vadd.f32 %v4036_v22, %v2258_v27 }
 0x9df   : > { %v2266_v30 = vpack.c.bf16 %v5107_v28, %v5107_v28 }
 0x9e1   : > { %4313 = vmatmul.mubr.msk.bf16.vlgmr.msra.gmra.mrb[28].mxu0 %vm723_vm0, %v2266_v30  ;;  %4329 = vmatmul.mubr.msk.bf16.vlgmr.msra.gmra.mrb[28].mxu1 %vm723_vm0, %v2266_v30 }
 0x9e2   : > { %4317 = vmatpush3.bf16.msra.mxu0 %v4491_v29  ;;  %4320 = vmatprep.mubr.msk.bf16.mxu0 %vm4618_vm1, %v4617_v6 }
 0x9e3   : > { %4318 = vmatprep.subr.bf16.mxu0 %v4617_v6  ;;  %4340 = vmatprep.mubr.msk.bf16.mxu1 %vm4618_vm1, %v4617_v6 }
 0x9e6   : > { %4319 = vmatpush3.bf16.msra.mxu0 %v4492_v31 }
 0x9e7   : > { %4332 = vmatprep.subr.bf16.mxu0 %v4617_v6 }
 0x9e9   : > { %4321 = vmatmul.mubr.msk.bf16.vlgmr.msra.gmra.mrb[32].mxu0 %vm723_vm0, %v2266_v30 }
 0x9ea   : > { %4334 = vmatprep.mubr.msk.bf16.mxu0 %vm4618_vm1, %v4617_v6 }
 0xab4   : > { %v2329_v32 = vpop.f32.mrb[28].mxu0  ;;  %v5128_v33 = vpop.f32.mrb[28].mxu1 }
 0xab5   : > { %v4314_v34 = vpop.f32.mrb[29].mxu0  ;;  %v4330_v35 = vpop.f32.mrb[29].mxu1  ;;  %v2330_v48 = vadd.f32 %v4042_v45, %v2329_v32 }
 0xab6   : > { %v2332_v36 = vpop.f32.mrb[30].mxu0  ;;  %v2462_v38 = vpop.f32.mrb[30].mxu1 }
 0xab7   : > { %v4315_v39 = vpop.f32.mrb[31].mxu0  ;;  %v4331_v40 = vpop.f32.mrb[31].mxu1 }
 0xabc   : > { %v2394_v42 = vpop.f32.mrb[32].mxu0 }
 0xabd   : > { %v2395_v43 = vadd.f32 %v4051_v41, %v2394_v42  ;;  %v4322_v44 = vpop.f32.mrb[33].mxu0 }
 0xabe   : > { %v2397_v46 = vpop.f32.mrb[34].mxu0 }
 0xabf   : > { %2619 = vrot.lane.b32.xlu1 %v2395_v43, %s4621_s2  ;;  %2616 = vrot.lane.b32.xlu0 %v2395_v43, %s5492_s0  ;;  %v4323_v47 = vpop.f32.mrb[35].mxu0 }
 0xac3   : > { %2622 = vrot.lane.b32.xlu1 %v2395_v43, %s5493_s4  ;;  %2466 = vrot.lane.b32.xlu0 %v2330_v48, %s5492_s0 }
 0xac7   : > { %2469 = vrot.lane.b32.xlu1 %v2330_v48, %s4621_s2  ;;  %2472 = vrot.lane.b32.xlu0 %v2330_v48, %s5493_s4 }
 0xb31   : > { %v2620_v49 = vpop.permute.xlu1 %2619  ;;  %v2617_v50 = vpop.permute.xlu0 %2616 }
 0xb32   : > { %v2625_v51 = vcombine.low %v2395_v43, %v2620_v49  ;;  %v2626_v53 = vcombine.high %v2395_v43, %v2620_v49 }
 0xb34   : > { %v2633_v60 = vrot.slane %v2625_v51, %v4869_v52  ;;  %v2640_v61 = vrot.slane %v2626_v53, %v4869_v52 }
 0xb35   : > { %v2623_v54 = vpop.permute.xlu1 %2622  ;;  %v2467_v55 = vpop.permute.xlu0 %2466 }
 0xb36   : > { %v2641_v59 = vcombine.low %v2617_v50, %v2623_v54  ;;  %v2642_v37 = vcombine.high %v2617_v50, %v2623_v54 }
 0xb38   : > { %v2649_v62 = vrot.slane %v2641_v59, %v4869_v52  ;;  %v2656_v63 = vrot.slane %v2642_v37, %v4869_v52 }
 0xb39   : > { %v2470_v0 = vpop.permute.xlu1 %2469  ;;  %v2473_v1 = vpop.permute.xlu0 %2472 }
 0xb3a   : > { %v2657_v56 = vcombine.low %v2633_v60, %v2649_v62  ;;  %v2658_v57 = vcombine.high %v2633_v60, %v2649_v62  ;;  %v2673_v4 = vcombine.low %v2640_v61, %v2656_v63  ;;  %v2674_v5 = vcombine.high %v2640_v61, %v2656_v63 }
 0xb3b   : > { %v2475_v7 = vcombine.low %v2330_v48, %v2470_v0  ;;  %v2476_v8 = vcombine.high %v2330_v48, %v2470_v0  ;;  %v2491_v9 = vcombine.low %v2467_v55, %v2473_v1  ;;  %v2492_v10 = vcombine.high %v2467_v55, %v2473_v1 }
 0xb3c   : > { %v2665_v11 = vrot.slane %v2657_v56, %v4871_v58  ;;  %v2672_v12 = vrot.slane %v2658_v57, %v4871_v58  ;;  %v2681_v13 = vrot.slane %v2673_v4, %v4871_v58  ;;  %v2688_v14 = vrot.slane %v2674_v5, %v4871_v58 }
 0xb3d   : > { %v2483_v15 = vrot.slane %v2475_v7, %v4869_v52  ;;  %v2490_v16 = vrot.slane %v2476_v8, %v4869_v52  ;;  %v2499_v17 = vrot.slane %v2491_v9, %v4869_v52  ;;  %v2506_v2 = vrot.slane %v2492_v10, %v4869_v52 }
 0xb3e   : > { %v2693_v18 = vcombine.low %v2665_v11, %v2672_v12  ;;  %v4066_v3 = vcombine.high %v2665_v11, %v2672_v12  ;;  %v2709_v19 = vcombine.low %v2681_v13, %v2688_v14  ;;  %v4067_v21 = vcombine.high %v2681_v13, %v2688_v14 }
 0xb3f   : > { %v2507_v23 = vcombine.low %v2483_v15, %v2499_v17  ;;  %v2508_v24 = vcombine.high %v2483_v15, %v2499_v17  ;;  %v2523_v25 = vcombine.low %v2490_v16, %v2506_v2  ;;  %v2524_v26 = vcombine.high %v2490_v16, %v2506_v2 }
 0xb40   : > { %v2700_v22 = vrot.slane %v2693_v18, %v4869_v52  ;;  %v2708_v27 = vrot.slane %v4066_v3, %v4869_v52  ;;  %v2716_v29 = vrot.slane %v2709_v19, %v4869_v52  ;;  %v2724_v30 = vrot.slane %v4067_v21, %v4869_v52 }
 0xb41   : > { %v2515_v31 = vrot.slane %v2507_v23, %v4871_v58  ;;  %v2522_v32 = vrot.slane %v2508_v24, %v4871_v58  ;;  %v2531_v34 = vrot.slane %v2523_v25, %v4871_v58  ;;  %v2538_v35 = vrot.slane %v2524_v26, %v4871_v58 }
 0xb42   : > { %v2725_v36 = vcombine.low %v2700_v22, %v2708_v27  ;;  %v2741_v38 = vcombine.low %v2716_v29, %v2724_v30  ;;  %v2726_v39 = vcombine.high %v2700_v22, %v2708_v27  ;;  %v2742_v40 = vcombine.high %v2716_v29, %v2724_v30 }
 0xb43   : > { %v2543_v41 = vcombine.low %v2515_v31, %v2522_v32  ;;  %v4064_v42 = vcombine.high %v2515_v31, %v2522_v32  ;;  %v2559_v43 = vcombine.low %v2531_v34, %v2538_v35  ;;  %v4065_v44 = vcombine.high %v2531_v34, %v2538_v35 }
 0xb44   : > { %v2733_v45 = vrot.slane %v2725_v36, %v4871_v58  ;;  %v2749_v46 = vrot.slane %v2741_v38, %v4871_v58  ;;  %v2740_v54 = vrot.slane %v2726_v39, %v4871_v58  ;;  %v2756_v55 = vrot.slane %v2742_v40, %v4871_v58 }
 0xb45   : > { %v2550_v47 = vrot.slane %v2543_v41, %v4869_v52  ;;  %v2558_v48 = vrot.slane %v4064_v42, %v4869_v52  ;;  %v2566_v49 = vrot.slane %v2559_v43, %v4869_v52  ;;  %v2574_v50 = vrot.slane %v4065_v44, %v4869_v52 }
 0xb46   : > { %v2757_v51 = vcombine.low %v2733_v45, %v2749_v46  ;;  %v2758_v53 = vcombine.high %v2733_v45, %v2749_v46  ;;  %v2759_v56 = vcombine.low %v2740_v54, %v2756_v55  ;;  %v2760_v57 = vcombine.high %v2740_v54, %v2756_v55 }
 0xb47   : > { %v2575_v59 = vcombine.low %v2550_v47, %v2558_v48  ;;  %v2591_v37 = vcombine.low %v2566_v49, %v2574_v50  ;;  %v2576_v4 = vcombine.high %v2550_v47, %v2558_v48  ;;  %v2592_v5 = vcombine.high %v2566_v49, %v2574_v50  ;;  %v4060_v47 = vld [vmem:[%s5429_s9 + $0x1] ss:$0 sm:$0xff] }
 0xb48   : > { %v2761_v60 = vpack.c.bf16 %v2757_v51, %v2757_v51  ;;  %v2762_v61 = vpack.c.bf16 %v2758_v53, %v2758_v53  ;;  %v2763_v9 = vpack.c.bf16 %v2759_v56, %v2759_v56  ;;  %v2764_v10 = vpack.c.bf16 %v2760_v57, %v2760_v57 }
 0xb49   : > { %v2583_v62 = vrot.slane %v2575_v59, %v4871_v58  ;;  %v2599_v63 = vrot.slane %v2591_v37, %v4871_v58  ;;  %v2590_v13 = vrot.slane %v2576_v4, %v4871_v58  ;;  %v2606_v14 = vrot.slane %v2592_v5, %v4871_v58 }
 0xb4a   : > { %v2919_v0 = vsel %vm1404_vm2, %v2761_v60, 0  ;;  %v2965_v1 = vsel %vm1404_vm2, %v2762_v61, 0  ;;  %v3011_v15 = vsel %vm1404_vm2, %v2763_v9, 0  ;;  %v3057_v16 = vsel %vm1404_vm2, %v2764_v10, 0 }
 0xb4b   : > { %4333 = vmatpush3.bf16.xpose.msra.mxu0 %v2919_v0  ;;  %4339 = vmatpush3.bf16.xpose.msra.mxu1 %v2965_v1  ;;  %v2607_v7 = vcombine.low %v2583_v62, %v2599_v63  ;;  %v2608_v8 = vcombine.high %v2583_v62, %v2599_v63  ;;  %v2609_v17 = vcombine.low %v2590_v13, %v2606_v14 }
 0xb4c   : > { %4344 = vmatprep.subr.bf16.mxu0 %v4617_v6  ;;  %4350 = vmatprep.subr.bf16.mxu1 %v4617_v6  ;;  %v2610_v2 = vcombine.high %v2590_v13, %v2606_v14  ;;  %v2460_v48 = vadd.f32 %v4060_v47, %v5128_v33 }
 0xb4d   : > { %v2611_v11 = vpack.c.bf16 %v2607_v7, %v2607_v7  ;;  %v2612_v12 = vpack.c.bf16 %v2608_v8, %v2608_v8  ;;  %v2613_v18 = vpack.c.bf16 %v2609_v17, %v2609_v17 }
 0xb4e   : > { %v2614_v3 = vpack.c.bf16 %v2610_v2, %v2610_v2 }
 0xb52   : > { %4335 = vmatmul.mubr.msk.bf16.vlgmr.msra.gmra.mrb[36].mxu0 %vm1404_vm2, %v2611_v11  ;;  %4341 = vmatmul.mubr.msk.bf16.vlgmr.msra.gmra.mrb[32].mxu1 %vm1404_vm2, %v2612_v12 }
 0xb53   : > { %4345 = vmatpush3.bf16.xpose.msra.mxu0 %v3011_v15  ;;  %4351 = vmatpush3.bf16.xpose.msra.mxu1 %v3057_v16 }
 0xb54   : > { %4346 = vmatprep.mubr.msk.bf16.mxu0 %vm4618_vm1, %v4617_v6  ;;  %4352 = vmatprep.mubr.msk.bf16.mxu1 %vm4618_vm1, %v4617_v6 }
 0xb55   : > { %4356 = vmatprep.subr.bf16.mxu0 %v4617_v6  ;;  %4362 = vmatprep.subr.bf16.mxu1 %v4617_v6 }
 0xb5a   : > { %4347 = vmatmul.mubr.msk.bf16.vlgmr.msra.gmra.mrb[40].mxu0 %vm1404_vm2, %v2613_v18  ;;  %4353 = vmatmul.mubr.msk.bf16.vlgmr.msra.gmra.mrb[36].mxu1 %vm1404_vm2, %v2614_v3 }
 0xb5b   : > { %4358 = vmatprep.mubr.msk.bf16.mxu0 %vm4618_vm1, %v4617_v6  ;;  %4364 = vmatprep.mubr.msk.bf16.mxu1 %vm4618_vm1, %v4617_v6 }
 0xc25   : > { %v2955_v19 = vpop.f32.mrb[36].mxu0  ;;  %v3001_v21 = vpop.f32.mrb[32].mxu1 }
 0xc26   : > { %v2956_v23 = vadd.f32 %v4929_v20, %v2955_v19  ;;  %v3002_v24 = vadd.f32 %v4929_v20, %v3001_v21  ;;  %v4336_v25 = vpop.f32.mrb[37].mxu0  ;;  %v4342_v26 = vpop.f32.mrb[33].mxu1 }
 0xc27   : > { %v2958_v22 = vpop.f32.mrb[38].mxu0  ;;  %v3004_v27 = vpop.f32.mrb[34].mxu1 }
 0xc28   : > { %v4337_v29 = vpop.f32.mrb[39].mxu0  ;;  %v4343_v30 = vpop.f32.mrb[35].mxu1  ;;  %v3102_v31 = vsel %vm1404_vm2, %v3002_v24, -inf  ;;  %v3099_v32 = vsel %vm1404_vm2, %v2956_v23, -inf }
 0xc29   : > { %3103 = vmax.xlane.f32.xlu0 %v3102_v31  ;;  %3100 = vmax.xlane.f32.xlu1 %v3099_v32 }
 0xc2d   : > { %v3047_v34 = vpop.f32.mrb[40].mxu0  ;;  %v3093_v35 = vpop.f32.mrb[36].mxu1 }
 0xc2e   : > { %v3048_v36 = vadd.f32 %v4929_v20, %v3047_v34  ;;  %v3094_v38 = vadd.f32 %v4929_v20, %v3093_v35  ;;  %v4348_v39 = vpop.f32.mrb[41].mxu0  ;;  %v4354_v40 = vpop.f32.mrb[37].mxu1 }
 0xc2f   : > { %v3050_v41 = vpop.f32.mrb[42].mxu0  ;;  %v3096_v42 = vpop.f32.mrb[38].mxu1 }
 0xc30   : > { %v4349_v43 = vpop.f32.mrb[43].mxu0  ;;  %v4355_v44 = vpop.f32.mrb[39].mxu1  ;;  %v3108_v45 = vsel %vm1404_vm2, %v3094_v38, -inf  ;;  %v3105_v46 = vsel %vm1404_vm2, %v3048_v36, -inf }
 0xc31   : > { %3109 = vmax.xlane.f32.xlu1 %v3108_v45  ;;  %3106 = vmax.xlane.f32.xlu0 %v3105_v46 }
 0xc42   : > { %2769 = vrot.lane.b32.xlu1 %v2460_v48, %s4621_s2  ;;  %s711_s2 = scalar_lea.vmem [#allocation2], %s710_s28 }
 0xc43   : > { %s3919_s6 = sshll.u32 %s711_s2, 4  ;;  %s5380_s6 = int_to_ptr.vmem [resolvable:$true] %s3919_s6 }
 0xc44   : > { %s4553_s1 = scalar_lea.vmem %s5380_s6, 16  ;;  %p4560_p0 = scmp.lt.s32.totalorder %s5380_s6, %s4558_s8 }
 0xc45   : > { %p4554_p11 = scmp.ne.s32.totalorder %s5380_s6, %s4553_s1 }
 0xc47   : > { %p4555_p12 = pnand %p4554_p11, %p4786_p5 }
 0xc49   : > { %p4556_p13 = pneg %p4555_p12 }
 0xcb6   : > { %v3104_v20 = vpop.xlane.xlu0 %3103  ;;  %v3101_v49 = vpop.xlane.xlu1 %3100 }
 0xcb7   : > { %v3112_v50 = vsub.f32 %v3002_v24, %v3104_v20  ;;  %v3111_v51 = vsub.f32 %v2956_v23, %v3101_v49 }
 0xcb9   : > { %v3117_v53 = vmul.f32 1.442695, %v3112_v50  ;;  %v3115_v54 = vmul.f32 1.442695, %v3111_v51 }
 0xcbb   : > { %4529 = vpow2.f32 %v3117_v53 }
 0xcbc   : > { %4531 = vpow2.f32 %v3115_v54 }
 0xcbe   : > { %v3110_v60 = vpop.xlane.xlu1 %3109  ;;  %v3107_v61 = vpop.xlane.xlu0 %3106 }
 0xcbf   : > { %v3114_v62 = vsub.f32 %v3094_v38, %v3110_v60  ;;  %v3113_v63 = vsub.f32 %v3048_v36, %v3107_v61 }
 0xcc1   : > { %v3121_v0 = vmul.f32 1.442695, %v3114_v62  ;;  %v3119_v1 = vmul.f32 1.442695, %v3113_v63 }
 0xcc2   : > { %v2770_v7 = vpop.permute.xlu1 %2769 }
 0xcc3   : > { %4533 = vpow2.f32 %v3121_v0  ;;  %v2775_v10 = vcombine.low %v2460_v48, %v2770_v7  ;;  %v2776_v11 = vcombine.high %v2460_v48, %v2770_v7 }
 0xcc4   : > { %4535 = vpow2.f32 %v3119_v1 }
 0xcc5   : > { %v5207_v55 = vpop.eup %4529  ;;  %v2783_v16 = vrot.slane %v2775_v10, %v4869_v52  ;;  %v2790_v17 = vrot.slane %v2776_v11, %v4869_v52 }
 0xcc6   : > { %v5209_v59 = vpop.eup %4531  ;;  %v3126_v37 = vsel %vm1404_vm2, %v5207_v55, 0.0 }
 0xcc7   : > { %3127 = vadd.xlane.f32.xlu1 %v3126_v37  ;;  %v3123_v33 = vsel %vm1404_vm2, %v5209_v59, 0.0 }
 0xcc8   : > { %3124 = vadd.xlane.f32.xlu0 %v3123_v33 }
 0xccd   : > { %v5217_v56 = vpop.eup %4533 }
 0xcce   : > { %v5219_v57 = vpop.eup %4535  ;;  %v3132_v4 = vsel %vm1404_vm2, %v5217_v56, 0.0 }
 0xccf   : > { %v3129_v5 = vsel %vm1404_vm2, %v5219_v57, 0.0 }
 0xcd8   : > { %2772 = vrot.lane.b32.xlu1 %v2460_v48, %s5493_s4  ;;  %s5496_s4 = smov 24  }
 0xcde   : > { %2766 = vrot.lane.b32.xlu0 %v2460_v48, %s5492_s0  ;;  %s5495_s0 = smov 8  }
 0xcfc   : > { %3133 = vadd.xlane.f32.xlu1 %v3132_v4 }
 0xcfd   : > { %3130 = vadd.xlane.f32.xlu0 %v3129_v5 }
 0xd54   : > { %v3128_v8 = vpop.xlane.xlu1 %3127 }
 0xd55   : > { %v3125_v9 = vpop.xlane.xlu0 %3124  ;;  %4537 = vrcp.f32 %v3128_v8 }
 0xd56   : > { %4539 = vrcp.f32 %v3125_v9 }
 0xd58   : > { %v2773_v12 = vpop.permute.xlu1 %2772 }
 0xd59   : > { %v2767_v13 = vpop.permute.xlu0 %2766 }
 0xd5a   : > { %v2791_v14 = vcombine.low %v2767_v13, %v2773_v12  ;;  %v2792_v15 = vcombine.high %v2767_v13, %v2773_v12 }
 0xd5c   : > { %v2799_v2 = vrot.slane %v2791_v14, %v4869_v52  ;;  %v2806_v18 = vrot.slane %v2792_v15, %v4869_v52 }
 0xd5e   : > { %v2807_v3 = vcombine.low %v2783_v16, %v2799_v2  ;;  %v2808_v19 = vcombine.high %v2783_v16, %v2799_v2  ;;  %v2823_v21 = vcombine.low %v2790_v17, %v2806_v18  ;;  %v2824_v23 = vcombine.high %v2790_v17, %v2806_v18 }
 0xd5f   : > { %v4538_v44 = vpop.eup %4537 }
 0xd60   : > { %v2815_v24 = vrot.slane %v2807_v3, %v4871_v58  ;;  %v2822_v25 = vrot.slane %v2808_v19, %v4871_v58  ;;  %v2831_v26 = vrot.slane %v2823_v21, %v4871_v58  ;;  %v2838_v22 = vrot.slane %v2824_v23, %v4871_v58  ;;  %v4540_v47 = vpop.eup %4539 }
 0xd61   : > { %v3140_v51 = vmul.f32 %v4538_v44, %v5207_v55  ;;  %v3139_v53 = vmul.f32 %v4540_v47, %v5209_v59 }
 0xd62   : > { %v2843_v27 = vcombine.low %v2815_v24, %v2822_v25  ;;  %v4068_v29 = vcombine.high %v2815_v24, %v2822_v25  ;;  %v2859_v30 = vcombine.low %v2831_v26, %v2838_v22  ;;  %v4069_v31 = vcombine.high %v2831_v26, %v2838_v22 }
 0xd63   : > { %v3143_v63 = vpack.c.bf16 %v3139_v53, %v3139_v53  ;;  %v3144_v0 = vpack.c.bf16 %v3140_v51, %v3140_v51 }
 0xd64   : > { %v2850_v32 = vrot.slane %v2843_v27, %v4869_v52  ;;  %v2858_v34 = vrot.slane %v4068_v29, %v4869_v52  ;;  %v2866_v35 = vrot.slane %v2859_v30, %v4869_v52  ;;  %v2874_v36 = vrot.slane %v4069_v31, %v4869_v52 }
 0xd66   : > { %v2875_v38 = vcombine.low %v2850_v32, %v2858_v34  ;;  %v2876_v39 = vcombine.high %v2850_v32, %v2858_v34  ;;  %v2891_v40 = vcombine.low %v2866_v35, %v2874_v36  ;;  %v2892_v41 = vcombine.high %v2866_v35, %v2874_v36 }
 0xd68   : > { %v2883_v42 = vrot.slane %v2875_v38, %v4871_v58  ;;  %v2890_v43 = vrot.slane %v2876_v39, %v4871_v58  ;;  %v2899_v45 = vrot.slane %v2891_v40, %v4871_v58  ;;  %v2906_v46 = vrot.slane %v2892_v41, %v4871_v58  ;;  %v4493_v40 = vld [vmem:[%s5430_s10 + $0x10] sm:$0xff]  }
 0xd6a   : > { %v2907_v48 = vcombine.low %v2883_v42, %v2899_v45  ;;  %v2908_v20 = vcombine.high %v2883_v42, %v2899_v45  ;;  %v2909_v49 = vcombine.low %v2890_v43, %v2906_v46  ;;  %v2910_v50 = vcombine.high %v2890_v43, %v2906_v46 }
 0xd6c   : > { %v2911_v54 = vpack.c.bf16 %v2907_v48, %v2907_v48  ;;  %v2912_v37 = vpack.c.bf16 %v2908_v20, %v2908_v20  ;;  %v2913_v61 = vpack.c.bf16 %v2909_v49, %v2909_v49  ;;  %v2914_v62 = vpack.c.bf16 %v2910_v50, %v2910_v50  ;;  %v4494_v20 = vld [vmem:[%s5430_s10 + $0x18] sm:$0xff]  }
 0xd6e   : > { %v3151_v33 = vsel %vm1640_vm3, %v2911_v54, 0  ;;  %v3197_v60 = vsel %vm1640_vm3, %v2912_v37, 0  ;;  %v3243_v55 = vsel %vm1640_vm3, %v2913_v61, 0  ;;  %v3289_v59 = vsel %vm1640_vm3, %v2914_v62, 0 }
 0xd6f   : > { %4357 = vmatpush3.bf16.msra.mxu0 %v3151_v33  ;;  %4363 = vmatpush3.bf16.msra.mxu1 %v3197_v60 }
 0xd70   : > { %4368 = vmatprep.subr.bf16.mxu0 %v4617_v6  ;;  %4374 = vmatprep.subr.bf16.mxu1 %v4617_v6 }
 0xd72   : > { %4359 = vmatmul.mubr.msk.bf16.vlgmr.msra.gmra.mrb[44].mxu0 %vm1404_vm2, %v3143_v63  ;;  %4365 = vmatmul.mubr.msk.bf16.vlgmr.msra.gmra.mrb[40].mxu1 %vm1404_vm2, %v3144_v0 }
 0xd73   : > { %4369 = vmatpush3.bf16.msra.mxu0 %v3243_v55  ;;  %4375 = vmatpush3.bf16.msra.mxu1 %v3289_v59 }
 0xd74   : > { %4370 = vmatprep.mubr.msk.bf16.mxu0 %vm4618_vm1, %v4617_v6  ;;  %4376 = vmatprep.mubr.msk.bf16.mxu1 %vm4618_vm1, %v4617_v6 }
 0xd75   : > { %4380 = vmatprep.subr.bf16.mxu0 %v4617_v6  ;;  %4388 = vmatprep.subr.bf16.mxu1 %v4617_v6 }
 0xd89   : > { %v3134_v1 = vpop.xlane.xlu1 %3133 }
 0xd8a   : > { %4541 = vrcp.f32 %v3134_v1  ;;  %v3131_v4 = vpop.xlane.xlu0 %3130 }
 0xd8b   : > { %4543 = vrcp.f32 %v3131_v4 }
 0xd94   : > { %v4542_v5 = vpop.eup %4541 }
 0xd95   : > { %v4544_v7 = vpop.eup %4543  ;;  %v3142_v8 = vmul.f32 %v4542_v5, %v5217_v56 }
 0xd96   : > { %v3141_v9 = vmul.f32 %v4544_v7, %v5219_v57 }
 0xd97   : > { %v3146_v10 = vpack.c.bf16 %v3142_v8, %v3142_v8 }
 0xd98   : > { %v3145_v11 = vpack.c.bf16 %v3141_v9, %v3141_v9 }
 0xd99   : > { %4377 = vmatmul.mubr.msk.bf16.vlgmr.msra.gmra.mrb[44].mxu1 %vm1404_vm2, %v3146_v10 }
 0xd9a   : > { %4371 = vmatmul.mubr.msk.bf16.vlgmr.msra.gmra.mrb[48].mxu0 %vm1404_vm2, %v3145_v11  ;;  %4392 = vmatprep.mubr.msk.bf16.mxu1 %vm4618_vm1, %v4617_v6  ;;  %v4085_v11 = vld [vmem:[%s5431_s11 + $0x1] ss:$0 sm:$0xff] }
 0xd9b   : > { %4384 = vmatprep.mubr.msk.bf16.mxu0 %vm4618_vm1, %v4617_v6  ;;  %4381 = vmatpush3.bf16.msra.mxu0 %v4493_v40  ;;  %v4500_v40 = vld [vmem:[%s5436_s16 + $0x38] sm:$0xff]  }
 0xd9c   : > { %4382 = vmatprep.subr.bf16.mxu0 %v4617_v6 }
 0xd9f   : > { %4383 = vmatpush3.bf16.msra.mxu0 %v4494_v20 }
 0xda0   : > { %4396 = vmatprep.subr.bf16.mxu0 %v4617_v6 }
 0xe45   : > { %v3187_v12 = vpop.f32.mrb[44].mxu0  ;;  %v3233_v13 = vpop.f32.mrb[40].mxu1 }
 0xe46   : > { %v4360_v14 = vpop.f32.mrb[45].mxu0  ;;  %v4366_v15 = vpop.f32.mrb[41].mxu1 }
 0xe47   : > { %v3190_v16 = vpop.f32.mrb[46].mxu0  ;;  %v3236_v56 = vpop.f32.mrb[42].mxu1 }
 0xe48   : > { %v4361_v17 = vpop.f32.mrb[47].mxu0  ;;  %v4367_v57 = vpop.f32.mrb[43].mxu1 }
 0xe6c   : > { %v3325_v2 = vpop.f32.mrb[44].mxu1 }
 0xe6d   : > { %v3279_v18 = vpop.f32.mrb[48].mxu0  ;;  %v3347_v3 = vcombine.low %v3233_v13, %v3325_v2  ;;  %v3348_v19 = vcombine.high %v3233_v13, %v3325_v2  ;;  %v4378_v21 = vpop.f32.mrb[45].mxu1 }
 0xe6e   : > { %v3331_v23 = vcombine.low %v3187_v12, %v3279_v18  ;;  %v3332_v24 = vcombine.high %v3187_v12, %v3279_v18  ;;  %v4372_v25 = vpop.f32.mrb[49].mxu0  ;;  %v3328_v26 = vpop.f32.mrb[46].mxu1  ;;  %v4495_v18 = vld [vmem:[%s5434_s14 + $0x10] sm:$0xff]  }
 0xe6f   : > { %v3355_v22 = vrot.slane %v3347_v3, %v4869_v52  ;;  %v3362_v27 = vrot.slane %v3348_v19, %v4869_v52  ;;  %v3282_v29 = vpop.f32.mrb[50].mxu0  ;;  %v4379_v30 = vpop.f32.mrb[47].mxu1  ;;  %4389 = vmatpush3.bf16.msra.mxu1 %v4495_v18  ;;  %v4496_v3 = vld [vmem:[%s5434_s14 + $0x18] sm:$0xff]  }
 0xe70   : > { %v3339_v31 = vrot.slane %v3331_v23, %v4869_v52  ;;  %v3346_v32 = vrot.slane %v3332_v24, %v4869_v52  ;;  %v4373_v34 = vpop.f32.mrb[51].mxu0  ;;  %4390 = vmatprep.subr.bf16.mxu1 %v4617_v6  ;;  %v4091_v29 = vld [vmem:[%s5432_s12 + $0x1] ss:$0 sm:$0xff] }
 0xe72   : > { %v3363_v35 = vcombine.low %v3339_v31, %v3355_v22  ;;  %v3364_v36 = vcombine.high %v3339_v31, %v3355_v22  ;;  %v3379_v38 = vcombine.low %v3346_v32, %v3362_v27  ;;  %v3380_v39 = vcombine.high %v3346_v32, %v3362_v27  ;;  %v4092_v31 = vld [vmem:[%s5433_s13 + $0x1] ss:$0 sm:$0xff] }
 0xe73   : > { %4391 = vmatpush3.bf16.msra.mxu1 %v4496_v3  ;;  %v4503_v3 = vld [vmem:[%s5442_s22] sm:$0xff]  }
 0xe74   : > { %v3371_v41 = vrot.slane %v3363_v35, %v4871_v58  ;;  %v3378_v42 = vrot.slane %v3364_v36, %v4871_v58  ;;  %v3387_v43 = vrot.slane %v3379_v38, %v4871_v58  ;;  %v3394_v44 = vrot.slane %v3380_v39, %v4871_v58  ;;  %4408 = vmatprep.subr.bf16.mxu1 %v4617_v6  ;;  %v4497_v36 = vld [vmem:[%s5436_s16 + $0x20] sm:$0xff]   ;;  %v4498_v38 = vld [vmem:[%s5436_s16 + $0x28] sm:$0xff]   ;;  %v4499_v39 = vld [vmem:[%s5436_s16 + $0x30] sm:$0xff]  }
 0xe76   : > { %v3399_v45 = vcombine.low %v3371_v41, %v3378_v42  ;;  %v4078_v46 = vcombine.high %v3371_v41, %v3378_v42  ;;  %v3415_v47 = vcombine.low %v3387_v43, %v3394_v44  ;;  %v4079_v48 = vcombine.high %v3387_v43, %v3394_v44  ;;  %v4098_v41 = vld [vmem:[%s5435_s15 + $0x1] ss:$0 sm:$0xff] }
 0xe78   : > { %v3406_v49 = vrot.slane %v3399_v45, %v4869_v52  ;;  %v3414_v50 = vrot.slane %v4078_v46, %v4869_v52  ;;  %v3422_v51 = vrot.slane %v3415_v47, %v4869_v52  ;;  %v3430_v53 = vrot.slane %v4079_v48, %v4869_v52 }
 0xe7a   : > { %v3432_v54 = vcombine.high %v3406_v49, %v3414_v50  ;;  %v3448_v37 = vcombine.high %v3422_v51, %v3430_v53  ;;  %v3431_v33 = vcombine.low %v3406_v49, %v3414_v50  ;;  %v3447_v60 = vcombine.low %v3422_v51, %v3430_v53 }
 0xe7c   : > { %v3446_v61 = vrot.slane %v3432_v54, %v4871_v58  ;;  %v3462_v62 = vrot.slane %v3448_v37, %v4871_v58  ;;  %v3439_v63 = vrot.slane %v3431_v33, %v4871_v58  ;;  %v3455_v0 = vrot.slane %v3447_v60, %v4871_v58  ;;  %v4111_v60 = vld [vmem:[%s5437_s17 + $0x1] ss:$0 sm:$0xff] }
 0xe7e   : > { %v3465_v55 = vcombine.low %v3446_v61, %v3462_v62  ;;  %v3464_v59 = vcombine.high %v3439_v63, %v3455_v0  ;;  %v3466_v1 = vcombine.high %v3446_v61, %v3462_v62  ;;  %v3463_v4 = vcombine.low %v3439_v63, %v3455_v0 }
 0xe80   : > { %3472 = vrot.lane.b32.xlu1 %v3465_v55, %s5494_s29  ;;  %3468 = vrot.lane.b32.xlu0 %v3464_v59, %s5495_s0  ;;  %s5497_s29 = sld [smem:[#allocation20_spill]] }
 0xe84   : > { %3476 = vrot.lane.b32.xlu0 %v3466_v1, %s5496_s4  ;;  %s3907_s4 = scalar_lea.sflag [#allocation3], %s710_s28 }
 0xe86   : > { %s5378_s0 = scalar_lea.hbm %s5497_s29, %s4127_s3  ;;  %s4559_s3 = scalar_lea.vmem %s4558_s8, 32 }
 0xe87   : > { %p4561_p1 = scmp.lt.s32.totalorder %s4559_s3, %s4553_s1 }
 0xe89   : > { %p4562_p2 = por %p4561_p1, %p4560_p0 }
 0xe8b   : > { %p4563_p3 = pnand %p4562_p2, %p4556_p13 }
 0xef2   : > { %v3469_v52 = vpop.permute.xlu0 %3468  ;;  %v3473_v5 = vpop.permute.xlu1 %3472 }
 0xef3   : > { %v3479_v7 = vsel %vm1404_vm2, %v3463_v4, %v3469_v52 }
 0xef4   : > { %v3480_v9 = vsel %vm1971_vm4, %v3479_v7, %v3473_v5  ;;  %v4501_v5 = vld [vmem:[%s5440_s20] sm:$0xff]   ;;  %v4502_v7 = vld [vmem:[%s5440_s20 + $0x8] sm:$0xff]  }
 0xef6   : > { %v3477_v8 = vpop.permute.xlu0 %3476 }
 0xef7   : > { %v3481_v10 = vsel %vm1973_vm5, %v3480_v9, %v3477_v8 }
 0xef8   : > { %v3482_v58 = vpack.c.bf16 %v3481_v10, %v3481_v10 }
 0xefa   : > { %4385 = vmatmul.mubr.msk.bf16.vlgmr.msra.gmra.mrb[52].mxu0 %vm723_vm0, %v3482_v58 }
 0xefb   : > { %4404 = vmatprep.mubr.msk.bf16.mxu0 %vm4618_vm1, %v4617_v6  ;;  %4397 = vmatpush3.bf16.msra.mxu0 %v4497_v36 }
 0xefc   : > { %4398 = vmatprep.subr.bf16.mxu0 %v4617_v6 }
 0xeff   : > { %4399 = vmatpush3.bf16.msra.mxu0 %v4498_v38 }
 0xf00   : > { %4400 = vmatprep.subr.bf16.mxu0 %v4617_v6 }
 0xf03   : > { %4401 = vmatpush3.bf16.msra.mxu0 %v4499_v39 }
 0xf04   : > { %4402 = vmatprep.subr.bf16.mxu0 %v4617_v6 }
 0xf07   : > { %4403 = vmatpush3.bf16.msra.mxu0 %v4500_v40 }
 0xfcd   : > { %v3545_v12 = vpop.f32.mrb[52].mxu0 }
 0xfce   : > { %v3546_v13 = vadd.f32 %v4085_v11, %v3545_v12  ;;  %v4386_v14 = vpop.f32.mrb[53].mxu0 }
 0xfcf   : > { %v3548_v15 = vpop.f32.mrb[54].mxu0 }
 0xfd0   : > { %v3551_v16 = vadd.f32 %v3546_v13, %v5107_v28  ;;  %v4387_v56 = vpop.f32.mrb[55].mxu0 }
 0xfd2   : > { %v3556_v17 = vsel %vm723_vm0, %v3551_v16, 0.0  ;;  %v3560_v57 = vmul.f32 %v3551_v16, %v3551_v16 }
 0xfd3   : > { %3557 = vadd.xlane.f32.xlu1 %v3556_v17  ;;  %v4120_v17 = vld [vmem:[%s5439_s19 + $0x1] ss:$0 sm:$0xff] }
 0xfd4   : > { %v3561_v2 = vsel %vm723_vm0, %v3560_v57, 0.0 }
 0xfd5   : > { %3562 = vadd.xlane.f32.xlu0 %v3561_v2 }
0x1060   : > { %v3558_v28 = vpop.xlane.xlu1 %3557 }
0x1061   : > { %v3559_v19 = vmul.f32 0.03125, %v3558_v28  ;;  %v4504_v28 = vld [vmem:[%s5442_s22 + $0x8] sm:$0xff]  }
0x1062   : > { %v3563_v21 = vpop.xlane.xlu0 %3562 }
0x1063   : > { %v3565_v23 = vmul.f32 %v3559_v19, %v3559_v19  ;;  %v3564_v24 = vmul.f32 0.03125, %v3563_v21  ;;  %v3567_v22 = vsub.f32 %v3551_v16, %v3559_v19  ;;  %v4119_v16 = vld [vmem:[%s5438_s18 + $0x1] ss:$0 sm:$0xff]  ;;  %v3787_v19 = vld [vmem:[%s5441_s21] sm:$0x1] }
0x1065   : > { %v3566_v25 = vsub.f32 %v3564_v24, %v3565_v23 }
0x1067   : > { %v3568_v26 = vadd.f32 1e-12, %v3566_v25 }
0x1069   : > { %4545 = vrsqrt.f32 %v3568_v26 }
0x1073   : > { %v4546_v27 = vpop.eup %4545 }
0x1074   : > { %v3570_v30 = vmul.f32 %v4546_v27, %v3567_v22 }
0x1076   : > { %v3577_v32 = vmul.f32 %v4091_v29, %v3570_v30 }
0x1078   : > { %v3584_v34 = vadd.f32 %v4092_v31, %v3577_v32 }
0x107a   : > { %v3585_v35 = vpack.c.bf16 %v3584_v34, %v3584_v34 }
0x107c   : > { %4393 = vmatmul.mubr.msk.bf16.vlgmr.msra.gmra.mrb[48].mxu1 %vm723_vm0, %v3585_v35 }
0x107d   : > { %4412 = vmatprep.mubr.msk.bf16.mxu1 %vm4618_vm1, %v4617_v6  ;;  %4409 = vmatpush3.bf16.msra.mxu1 %v4501_v5 }
0x107e   : > { %4410 = vmatprep.subr.bf16.mxu1 %v4617_v6 }
0x1081   : > { %4411 = vmatpush3.bf16.msra.mxu1 %v4502_v7 }
0x1082   : > { %4416 = vmatprep.subr.bf16.mxu1 %v4617_v6 }
0x114f   : > { %v3648_v42 = vpop.f32.mrb[48].mxu1 }
0x1150   : > { %v3649_v43 = vadd.f32 %v4098_v41, %v3648_v42  ;;  %v4394_v44 = vpop.f32.mrb[49].mxu1 }
0x1151   : > { %v3651_v45 = vpop.f32.mrb[50].mxu1 }
0x1152   : > { %v3654_v46 = vmul.f32 %v3649_v43, %v3649_v43  ;;  %v4395_v47 = vpop.f32.mrb[51].mxu1 }
0x1154   : > { %v3655_v48 = vmul.f32 %v3654_v46, %v3649_v43 }
0x1156   : > { %v3656_v20 = vmul.f32 0.044715, %v3655_v48 }
0x1158   : > { %v3657_v49 = vadd.f32 %v3656_v20, %v3649_v43 }
0x115a   : > { %v3658_v50 = vmul.f32 0.7978846, %v3657_v49 }
0x115c   : > { %4547 = vtanh.f32 %v3658_v50 }
0x1166   : > { %v4548_v51 = vpop.eup %4547 }
0x1167   : > { %v3660_v53 = vadd.f32 1.0, %v4548_v51 }
0x1169   : > { %v3661_v54 = vmul.f32 0.5, %v3660_v53 }
0x116b   : > { %v3662_v37 = vmul.f32 %v3661_v54, %v3649_v43 }
0x116d   : > { %v3663_v33 = vpack.c.bf16 %v3662_v37, %v3662_v37 }
0x116f   : > { %4405 = vmatmul.mubr.msk.bf16.vlgmr.msra.gmra.mrb[56].mxu0 %vm2190_vm6, %v3663_v33 }
0x1242   : > { %v3742_v61 = vpop.f32.mrb[56].mxu0 }
0x1243   : > { %v3743_v62 = vadd.f32 %v4111_v60, %v3742_v61  ;;  %v4406_v63 = vpop.f32.mrb[57].mxu0 }
0x1244   : > { %v3745_v0 = vpop.f32.mrb[58].mxu0 }
0x1245   : > { %v3748_v55 = vadd.f32 %v3743_v62, %v3584_v34  ;;  %v4407_v59 = vpop.f32.mrb[59].mxu0 }
0x1247   : > { %v3753_v1 = vsel %vm723_vm0, %v3748_v55, 0.0  ;;  %v3757_v4 = vmul.f32 %v3748_v55, %v3748_v55 }
0x1248   : > { %3754 = vadd.xlane.f32.xlu0 %v3753_v1 }
0x1249   : > { %v3758_v52 = vsel %vm723_vm0, %v3757_v4, 0.0 }
0x124a   : > { %3759 = vadd.xlane.f32.xlu1 %v3758_v52 }
0x12d5   : > { %v3755_v8 = vpop.xlane.xlu0 %3754 }
0x12d6   : > { %v3756_v9 = vmul.f32 0.03125, %v3755_v8 }
0x12d7   : > { %v3760_v10 = vpop.xlane.xlu1 %3759 }
0x12d8   : > { %v3762_v58 = vmul.f32 %v3756_v9, %v3756_v9  ;;  %v3761_v11 = vmul.f32 0.03125, %v3760_v10  ;;  %v3764_v14 = vsub.f32 %v3748_v55, %v3756_v9 }
0x12da   : > { %v3763_v12 = vsub.f32 %v3761_v11, %v3762_v58 }
0x12dc   : > { %v3765_v13 = vadd.f32 1e-12, %v3763_v12 }
0x12de   : > { %4549 = vrsqrt.f32 %v3765_v13 }
0x12e8   : > { %v4550_v15 = vpop.eup %4549 }
0x12e9   : > { %v3767_v56 = vmul.f32 %v4550_v15, %v3764_v14 }
0x12eb   : > { %v3774_v57 = vmul.f32 %v4119_v16, %v3767_v56 }
0x12ed   : > { %v3781_v2 = vadd.f32 %v4120_v17, %v3774_v57 }
0x12ef   : > { %v3782_v18 = vpack.c.bf16 %v3781_v2, %v3781_v2 }
0x12f1   : > { %4413 = vmatmul.mubr.msk.bf16.vlgmr.msra.gmra.mrb[52].mxu1 %vm723_vm0, %v3782_v18 }
0x12f2   : > { %4420 = vmatprep.mubr.msk.bf16.mxu1 %vm4618_vm1, %v4617_v6  ;;  %4417 = vmatpush3.bf16.msra.mxu1 %v4503_v3 }
0x12f3   : > { %4418 = vmatprep.subr.bf16.mxu1 %v4617_v6 }
0x12f6   : > { %4419 = vmatpush3.bf16.msra.mxu1 %v4504_v28 }
0x13c4   : > { %v3837_v21 = vpop.f32.mrb[52].mxu1 }
0x13c5   : > { %v3838_v23 = vadd.f32 %v3837_v21, %v3787_v19  ;;  %v4414_v24 = vpop.f32.mrb[53].mxu1 }
0x13c6   : > { %v3840_v25 = vpop.f32.mrb[54].mxu1 }
0x13c7   : > { %4551 = vtanh.f32 %v3838_v23  ;;  %v4415_v26 = vpop.f32.mrb[55].mxu1 }
0x13d1   : > { %v4552_v22 = vpop.eup %4551 }
0x13d2   : > { %v3844_v27 = vpack.c.bf16 %v4552_v22, %v4552_v22 }
0x13d4   : > { %4421 = vmatmul.mubr.msk.bf16.vlgmr.msra.gmra.mrb[56].mxu1 %vm723_vm0, %v3844_v27 }
0x14a7   : > { %v3898_v6 = vpop.f32.mrb[56].mxu1 }
0x14a8   : > { %3905 = vst.msk [vmem:[%s711_s2] sm:$0x1] %vm3904_vm7, %v3898_v6  ;;  %v4422_v29 = vpop.f32.mrb[57].mxu1 }
0x14a9   : > { %v3901_v30 = vpop.f32.mrb[58].mxu1 }
0x14aa   : > { %4566 = shalt.err (!%p4563_p3)
}
0x14ab   : > { %s4567_s28 = scalar_lea.hbm %s5378_s0, 16  ;;  %s4571_s25 = scalar_lea.hbm %s5497_s29, 32 }
0x14ac   : > { %p4568_p4 = scmp.ne.s32.totalorder %s5378_s0, %s4567_s28  ;;  %p4572_p9 = scmp.lt.u32.totalorder %s5378_s0, %s5497_s29 }
0x14ad   : > { %p4573_p10 = scmp.lt.u32.totalorder %s4571_s25, %s4567_s28  ;;  %p4575_p12 = scmp.lt.u32.totalorder %s4567_s28, %s5378_s0 }
0x14ae   : > { %p4569_p7 = pnand %p4568_p4, %p4786_p5 }
0x14af   : > { %p4574_p11 = por %p4573_p10, %p4572_p9 }
0x14b0   : > { %p4570_p8 = pneg %p4569_p7 }
0x14b1   : > { %p4576_p13 = por %p4575_p12, %p4574_p11 }
0x14b3   : > { %p4577_p0 = pnand %p4576_p13, %p4570_p8 }
0x14b5   : > { %4580 = shalt.err (!%p4577_p0)
}
0x14b6   : > { %4424 = dma.vmem_to_hbm [thread:$0]  (%p4786_p5), %s5380_s6, 16, %s5378_s0, %s3907_s4   ;;  %v4423_v31 = vpop.f32.mrb[59].mxu1 }
0x14b7 PF: > { %s5498_s1 = sld [smem:[#allocation7_spill]]  ;;  %s5499_s3 = sld [smem:[#allocation5_spill]] }
0x14bd   : > { %p4430_p1 = scmp.ge.s32.totalorder %s5498_s1, 2  ;;  %s3931_s24 = sand.u32 1, %s5499_s3  }
0x14be   : > { %s3932_s25 = scalar_lea.sflag [#allocation3], %s3931_s24 }
0x14bf   : > { %p4427_p2 = pnand %p4430_p1, %p4790_p6 }
0x14c1   : > { %4598 = dma.done.wait (!%p4427_p2), %s3932_s25, 16  }
0x14c2   : > { %4600 = vsyncadd (!%p4427_p2), %s3932_s25, 4294967280  ;;  %s5501_s25 = sld [smem:[#allocation8_spill]]  ;;  %s5502_s28 = sld [smem:[#allocation6_spill]] }
0x14c3   : > { %s5503_s24 = sld [smem:[#allocation9_spill]]  ;;  %s5504_s4 = smov %s4607_s30 }
0x14c8   : > { %p33_p3 = scmp.ge.s32.totalorder %s5501_s25, 4   ;;  %s5505_s30 = smov %s5502_s28 }
0x14ca   :  { %35 = sbr.rel (!%p33_p3) target bundleno = 14 (0xe), region = 166 }
0x14d1   :  { %3936 = vsyncpa [#allocation3], 1 }
0x14d2   :  { %3938 = vsyncpa [#allocation3 + $0x1], 1 }

</bundles_post_ra>
